<compile_context>
chip_gen: v7x
topology: tpu7x:2x2x1
jax: 0.10.0
libtpu: 0.0.40
codegen_flags: <defaults>
</compile_context>

<pallas_src>
import jax
import jax.numpy as jnp
from jax.experimental import pallas as pl
from jax.experimental.pallas import tpu as pltpu

C_IN = 96
C_OUT = 128
EPS = 1e-5


def _fused_kernel(x_ref, w_ref, s1_ref, b1_ref, b2_ref, o_ref):
    # x_ref : (1, C_IN, TM)      input activations (channel-major)
    # w_ref : (C_OUT, C_IN)      conv weight with BN2 scale folded in
    # s1/b1 : (C_IN, 1)          folded BN1 scale / shift
    # b2    : (C_OUT, 1)         folded BN2 shift
    # o_ref : (1, C_OUT, TM)
    x = x_ref[0].astype(jnp.float32)
    # BN1 (folded) + ReLU
    h = jnp.maximum(x * s1_ref[...] + b1_ref[...], 0.0)
    # 1x1 conv (+ BN2 scale, already folded into w) on the MXU
    y = jnp.dot(w_ref[...], h, preferred_element_type=jnp.float32)
    # BN2 shift + ReLU
    y = jnp.maximum(y + b2_ref[...], 0.0)
    o_ref[0] = y.astype(o_ref.dtype)


def fused_bn_relu_conv_bn_relu(x_nchw, w_oi, s1, b1, s2, b2, *, tm=1024):
    """x_nchw: (N, 96, H, W); w_oi: (128, 96) (PyTorch conv weight, k=1 squeezed)."""
    N, C, H, W = x_nchw.shape
    assert C == C_IN and w_oi.shape == (C_OUT, C_IN)
    HW = H * W

    # Channel-major flatten: pure reshape, no transpose / no extra HBM traffic.
    x3 = x_nchw.reshape(N, C_IN, HW)

    # Fold BN2 scale into the conv weight; keep only the shift in-kernel.
    w2 = (w_oi.astype(jnp.float32) * s2.astype(jnp.float32)[:, None])  # (C_OUT, C_IN)
    s1c = s1.reshape(C_IN, 1).astype(jnp.float32)
    b1c = b1.reshape(C_IN, 1).astype(jnp.float32)
    b2c = b2.reshape(C_OUT, 1).astype(jnp.float32)

    # Spatial tile: big (multiple of 128) to amortize per-step pipeline overhead;
    # if HW is small, a full-extent block is always layout-legal.
    if HW <= tm:
        tm_hw = HW
    else:
        assert tm % 128 == 0
        tm_hw = tm

    grid = (N, pl.cdiv(HW, tm_hw))  # ragged last block handled by Pallas masking

    out = pl.pallas_call(
        _fused_kernel,
        out_shape=jax.ShapeDtypeStruct((N, C_OUT, HW), x_nchw.dtype),
        grid_spec=pltpu.PrefetchScalarGridSpec(
            num_scalar_prefetch=0,
            grid=grid,
            in_specs=[
                pl.BlockSpec((1, C_IN, tm_hw), lambda n, j: (n, 0, j)),
                pl.BlockSpec((C_OUT, C_IN), lambda n, j: (0, 0)),
                pl.BlockSpec((C_IN, 1), lambda n, j: (0, 0)),
                pl.BlockSpec((C_IN, 1), lambda n, j: (0, 0)),
                pl.BlockSpec((C_OUT, 1), lambda n, j: (0, 0)),
            ],
            out_specs=pl.BlockSpec((1, C_OUT, tm_hw), lambda n, j: (n, 0, j)),
        ),
        compiler_params=pltpu.CompilerParams(
            dimension_semantics=("parallel", "parallel"),
        ),
    )(x3, w2, s1c, b1c, b2c)

    return out.reshape(N, C_OUT, H, W)


def _reference(x_nchw, w_oi, s1, b1, s2, b2):
    xf = x_nchw.astype(jnp.float32)
    h = jnp.maximum(xf * s1[None, :, None, None] + b1[None, :, None, None], 0.0)
    y = jnp.einsum("nchw,oc->nohw", h, w_oi, preferred_element_type=jnp.float32)
    y = jnp.maximum(y * s2[None, :, None, None] + b2[None, :, None, None], 0.0)
    return y.astype(x_nchw.dtype)


if __name__ == "__main__":
    key = jax.random.PRNGKey(0)
    ks = jax.random.split(key, 10)

    # Shapes consistent with the module spec: x12 = randn([1, 96, 56, 56]).
    N, H, W = 1, 56, 56
    x = jax.random.normal(ks[0], (N, C_IN, H, W), dtype=jnp.float32)

    # Conv weight: PyTorch shape (128, 96, 1, 1) -> (128, 96) (channel-major).
    w_torch = jax.random.normal(ks[1], (C_OUT, C_IN, 1, 1), dtype=jnp.float32) * 0.1
    w_oi = w_torch[:, :, 0, 0]

    # BatchNorm parameters (inference / running-stats semantics).
    g1 = jax.random.normal(ks[2], (C_IN,), dtype=jnp.float32) * 0.1 + 1.0
    beta1 = jax.random.normal(ks[3], (C_IN,), dtype=jnp.float32) * 0.1
    mean1 = jax.random.normal(ks[4], (C_IN,), dtype=jnp.float32) * 0.1
    var1 = jnp.abs(jax.random.normal(ks[5], (C_IN,), dtype=jnp.float32)) * 0.1 + 1.0

    g2 = jax.random.normal(ks[6], (C_OUT,), dtype=jnp.float32) * 0.1 + 1.0
    beta2 = jax.random.normal(ks[7], (C_OUT,), dtype=jnp.float32) * 0.1
    mean2 = jax.random.normal(ks[8], (C_OUT,), dtype=jnp.float32) * 0.1
    var2 = jnp.abs(jax.random.normal(ks[9], (C_OUT,), dtype=jnp.float32)) * 0.1 + 1.0

    # Fold BN into per-channel scale/shift.
    s1 = g1 / jnp.sqrt(var1 + EPS)
    b1 = beta1 - mean1 * s1
    s2 = g2 / jnp.sqrt(var2 + EPS)
    b2 = beta2 - mean2 * s2

    out = fused_bn_relu_conv_bn_relu(x, w_oi, s1, b1, s2, b2)
    out = jax.block_until_ready(out)

    ref = _reference(x, w_oi, s1, b1, s2, b2)
    assert out.shape == (N, C_OUT, H, W)
    assert jnp.allclose(out, ref, atol=1e-3, rtol=1e-3), float(
        jnp.max(jnp.abs(out - ref))
    )
    print("KERNEL_OK")
</pallas_src>

<mosaic_0001>
module attributes {stable_mosaic.version = 11 : i64} {
  func.func @_fused_kernel(%arg0: i32, %arg1: i32, %arg2: memref<1x96x1024xf32, #tpu.memory_space<vmem>>, %arg3: memref<128x96xf32, #tpu.memory_space<vmem>>, %arg4: memref<96x1xf32, #tpu.memory_space<vmem>>, %arg5: memref<96x1xf32, #tpu.memory_space<vmem>>, %arg6: memref<128x1xf32, #tpu.memory_space<vmem>>, %arg7: memref<1x128x1024xf32, #tpu.memory_space<vmem>>) attributes {dimension_semantics = [#tpu.dimension_semantics<parallel>, #tpu.dimension_semantics<parallel>], iteration_bounds = array<i64: 1, 4>, scalar_prefetch = 0 : i64, scratch_operands = 0 : i64, tpu.core_type = #tpu.core_type<tc>, window_params = [{transform_indices = @transform_0, window_bounds = array<i64: 1, 96, 1024>}, {pipeline_mode = #tpu.pipeline_mode<synchronous>, transform_indices = @transform_1, window_bounds = array<i64: 128, 96>}, {pipeline_mode = #tpu.pipeline_mode<synchronous>, transform_indices = @transform_2, window_bounds = array<i64: 96, 1>}, {pipeline_mode = #tpu.pipeline_mode<synchronous>, transform_indices = @transform_3, window_bounds = array<i64: 96, 1>}, {pipeline_mode = #tpu.pipeline_mode<synchronous>, transform_indices = @transform_4, window_bounds = array<i64: 128, 1>}, {transform_indices = @transform_5, window_bounds = array<i64: 1, 128, 1024>}]} {
    %c0 = arith.constant 0 : index
    %c0_0 = arith.constant 0 : index
    %c0_1 = arith.constant 0 : index
    %0 = vector.load %arg2[%c0, %c0_0, %c0_1] : memref<1x96x1024xf32, #tpu.memory_space<vmem>>, vector<1x96x1024xf32>
    %1 = vector.shape_cast %0 : vector<1x96x1024xf32> to vector<96x1024xf32>
    %c0_2 = arith.constant 0 : index
    %c0_3 = arith.constant 0 : index
    %2 = vector.load %arg4[%c0_2, %c0_3] : memref<96x1xf32, #tpu.memory_space<vmem>>, vector<96x1xf32>
    %3 = vector.broadcast %2 : vector<96x1xf32> to vector<96x1024xf32>
    %4 = arith.mulf %1, %3 : vector<96x1024xf32>
    %c0_4 = arith.constant 0 : index
    %c0_5 = arith.constant 0 : index
    %5 = vector.load %arg5[%c0_4, %c0_5] : memref<96x1xf32, #tpu.memory_space<vmem>>, vector<96x1xf32>
    %6 = vector.broadcast %5 : vector<96x1xf32> to vector<96x1024xf32>
    %7 = arith.addf %4, %6 : vector<96x1024xf32>
    %cst = arith.constant 0.000000e+00 : f32
    %8 = vector.broadcast %cst : f32 to vector<96x1024xf32>
    %9 = arith.maximumf %7, %8 : vector<96x1024xf32>
    %c0_6 = arith.constant 0 : index
    %c0_7 = arith.constant 0 : index
    %10 = vector.load %arg3[%c0_6, %c0_7] : memref<128x96xf32, #tpu.memory_space<vmem>>, vector<128x96xf32>
    %cst_8 = arith.constant dense<0.000000e+00> : vector<128x1024xf32>
    %11 = tpu.matmul %10, %9, %cst_8 {dimension_numbers = #tpu.dot_dimension_numbers<[1], [0], [0], [1], [0, 0, 1, 1], [], []>} : vector<128x96xf32>, vector<96x1024xf32>, vector<128x1024xf32> -> vector<128x1024xf32>
    %c0_9 = arith.constant 0 : index
    %c0_10 = arith.constant 0 : index
    %12 = vector.load %arg6[%c0_9, %c0_10] : memref<128x1xf32, #tpu.memory_space<vmem>>, vector<128x1xf32>
    %13 = vector.broadcast %12 : vector<128x1xf32> to vector<128x1024xf32>
    %14 = arith.addf %11, %13 : vector<128x1024xf32>
    %cst_11 = arith.constant 0.000000e+00 : f32
    %15 = vector.broadcast %cst_11 : f32 to vector<128x1024xf32>
    %16 = arith.maximumf %14, %15 : vector<128x1024xf32>
    %c0_12 = arith.constant 0 : index
    %c0_13 = arith.constant 0 : index
    %c0_14 = arith.constant 0 : index
    %17 = vector.load %arg7[%c0_12, %c0_13, %c0_14] : memref<1x128x1024xf32, #tpu.memory_space<vmem>>, vector<1x128x1024xf32>
    %18 = vector.shape_cast %17 : vector<1x128x1024xf32> to vector<128x1024xf32>
    %19 = vector.shape_cast %16 : vector<128x1024xf32> to vector<1x128x1024xf32>
    tpu.vector_store %arg7[%c0_12, %c0_13, %c0_14], %19 {strides = array<i32>} : memref<1x128x1024xf32, #tpu.memory_space<vmem>>, vector<1x128x1024xf32>,
    return
  }
  func.func @transform_0(%arg0: i32, %arg1: i32) -> (i32, i32, i32) {
    %c0_i32 = arith.constant 0 : i32
    %c0_i32_0 = arith.constant 0 : i32
    return %arg0, %c0_i32, %arg1 : i32, i32, i32
  }
  func.func @transform_1(%arg0: i32, %arg1: i32) -> (i32, i32) {
    %c0_i32 = arith.constant 0 : i32
    %c0_i32_0 = arith.constant 0 : i32
    %c0_i32_1 = arith.constant 0 : i32
    return %c0_i32, %c0_i32_0 : i32, i32
  }
  func.func @transform_2(%arg0: i32, %arg1: i32) -> (i32, i32) {
    %c0_i32 = arith.constant 0 : i32
    %c0_i32_0 = arith.constant 0 : i32
    %c0_i32_1 = arith.constant 0 : i32
    return %c0_i32, %c0_i32_0 : i32, i32
  }
  func.func @transform_3(%arg0: i32, %arg1: i32) -> (i32, i32) {
    %c0_i32 = arith.constant 0 : i32
    %c0_i32_0 = arith.constant 0 : i32
    %c0_i32_1 = arith.constant 0 : i32
    return %c0_i32, %c0_i32_0 : i32, i32
  }
  func.func @transform_4(%arg0: i32, %arg1: i32) -> (i32, i32) {
    %c0_i32 = arith.constant 0 : i32
    %c0_i32_0 = arith.constant 0 : i32
    %c0_i32_1 = arith.constant 0 : i32
    return %c0_i32, %c0_i32_0 : i32, i32
  }
  func.func @transform_5(%arg0: i32, %arg1: i32) -> (i32, i32, i32) {
    %c0_i32 = arith.constant 0 : i32
    %c0_i32_0 = arith.constant 0 : i32
    return %arg0, %c0_i32, %arg1 : i32, i32, i32
  }
}

</mosaic_0001>

<bundles_post_ra>
// kernel: tpu_custom_call.1
= control target key start
LH: loop header
LB: loop body
LE: loop exit
PB: predicated region body
PF: predicated region fallthrough
CT: control target
= control target key end

     0   :  { %10 = vsyncpa [#allocation3], 0  ;;  %s5033_s0 = inlined_call_operand.hbm [shape: f32[1,96,3136], index: 0, kind: input, shape index: {}]   ;;  %s5034_s1 = inlined_call_operand.vmem [shape: f32[128,96], index: 1, kind: input, shape index: {}]   ;;  %s5035_s2 = inlined_call_operand.vmem [shape: f32[96,1], index: 2, kind: input, shape index: {}]   ;;  %s5036_s3 = inlined_call_operand.vmem [shape: f32[96,1], index: 3, kind: input, shape index: {}]   ;;  %s5037_s4 = inlined_call_operand.vmem [shape: f32[128,1], index: 4, kind: input, shape index: {}]   ;;  %s5038_s5 = inlined_call_operand.vmem [shape: f32[1,128,3136], index: 5, kind: output, shape index: {}]  }
   0x1   :  { %12 = vsyncpa [#allocation3 + $0x1], 0  ;;  %s3198_s18 = smov 0   ;;  %s3200_s19 = smov 0  }
   0x2   :  { %s3202_s20 = smov 0   ;;  %s3204_s21 = smov 0  }
   0x3   :  { %s3206_s22 = smov 0   ;;  %s3208_s23 = smov 0  }
   0x4 LB: > { %s2559_s24 = sadd.s32 4294967295, %s3095_s23   ;;  %s27_s25 = sadd.s32 1, %s3091_s22  ;;  %s3095_s23 = sphi %s3208_s23, %s18_s23   ;;  %s3091_s22 = sphi %s3206_s22, %s5061_s22   ;;  %s3087_s21 = sphi %s3204_s21, %s5060_s21   ;;  %s3083_s20 = sphi %s3202_s20, %s5059_s20   ;;  %s3079_s19 = sphi %s3200_s19, %s5058_s19   ;;  %s3075_s18 = sphi %s3198_s18, %s5057_s18  }
   0x5   : > { %p28_p0 = scmp.ge.s32.totalorder %s27_s25, 4  ;;  %s39_s26 = sadd.s32 1, %s3083_s20 }
   0x6   : > { %p46_p1 = scmp.ne.s32.totalorder %s3083_s20, %s3079_s19  ;;  %p47_p2 = scmp.eq.s32.totalorder %s3095_s23, 0 }
   0x7   : > { %s5063_s25 = smov (%p28_p0, %s27_s25), 0  ;;  %p52_p4 = scmp.ne.s32.totalorder %s3079_s19, %s3075_s18 }
   0x8   : > { %p48_p3 = por %p47_p2, %p46_p1  ;;  %s35_s27 = ssub.s32 %s3091_s22, %s5063_s25 }
   0x9   : > { %p53_p5 = scmp.eq.s32.totalorder %s2559_s24, 0  ;;  %p37_p6 = scmp.eq.s32.totalorder %s35_s27, 0 }
   0xa   : > { %p162_p7 = scmp.eq.s32.totalorder %s2559_s24, 3  ;;  %p2562_p10 = scmp.ge.s32.totalorder %s3095_s23, 4 }
   0xb   : > { %p3237_p8 = por %p53_p5, %p52_p4 }
   0xc   : > { %s3242_s29 = scalar_select %p37_p6, %s3083_s20, %s39_s26  }
   0xd   : > { %p3244_p9 = por %p162_p7, %p46_p1  ;;  %196 = sbr.rel (%p2562_p10) target bundleno = 56 (0x38), region = 32 }
  0x14   : > { %199 = sbr.rel (!%p48_p3) target bundleno = 56 (0x38), region = 36  ;;  %s200_s6 = sand.u32 (%p48_p3), 1, %s3083_s20  }
  0x15   : > { %s2563_s7 = sshll.u32 (%p48_p3), %s3091_s22, 3  ;;  %s2766_s8 = smul.u32 (%p48_p3), 768, %s200_s6 }
  0x16   : > { %s206_s9 = ssub.s32 (%p48_p3), 25, %s2563_s7  ;;  %s3257_s12 = scalar_lea.sflag (%p48_p3), [#allocation3], %s200_s6 }
  0x17   : > { %p207_p11 = scmp.lt.s32.totalorder (%p48_p3), %s206_s9, 8  ;;  %s204_s13 = scalar_lea.vmem (%p48_p3), [#allocation2], %s2766_s8 }
  0x1b   : > { %s5065_s9 = smov (!%p207_p11, %s206_s9), 8 }
  0x1c   : > { %s3254_s10 = smul.u32 1536, %s5065_s9 }
  0x1e   : > { %s211_s11 = ssub.s32 12288, %s3254_s10 }
  0x1f   : > { %212 = vsyncadd %s3257_s12, %s211_s11  ;;  %p2564_p12 = scmp.ne.s32.totalorder %s3254_s10, 0  ;;  %s2664_s14 = sshll.u32 %s3091_s22, 10 }
  0x20   : > { %s3265_s17 = scalar_lea.hbm %s5033_s0, %s2664_s14  ;;  %s2566_s18 = sshll.u32 %s5065_s9, 3 }
  0x21   : > { %s220_s24 = sshll.u32 %s204_s13, 4  ;;  %s2953_s26 = scalar_lea.hbm %s3265_s17, %s3254_s10  ;;  %s3268_s24 = int_to_ptr.vmem [resolvable:$true] %s220_s24 }
  0x22   : > { %p2954_p13 = scmp.ne.s32.totalorder %s3265_s17, %s2953_s26  ;;  %s2957_s7 = scalar_lea.hbm %s5033_s0, 38400 }
  0x23   : > { %p2958_p2 = scmp.lt.u32.totalorder %s3265_s17, %s5033_s0  ;;  %p2959_p3 = scmp.lt.u32.totalorder %s2957_s7, %s2953_s26 }
  0x24   : > { %p2955_p0 = pnand %p2954_p13, %p2564_p12  ;;  %p2961_p5 = scmp.lt.u32.totalorder %s2953_s26, %s3265_s17 }
  0x25   : > { %p2960_p4 = por %p2959_p3, %p2958_p2 }
  0x26   : > { %p2956_p1 = pneg %p2955_p0 }
  0x27   : > { %p2962_p6 = por %p2961_p5, %p2960_p4 }
  0x29   : > { %p2963_p7 = pnand %p2962_p6, %p2956_p1 }
  0x2b   : > { %2966 = shalt.err (!%p2963_p7)
}
  0x2c   : > { %s2967_s13 = scalar_lea.vmem %s3268_s24, %s3254_s10  ;;  %s3161_s14 = smov [#allocation2]  }
  0x2d   : > { %p2968_p10 = scmp.ne.s32.totalorder %s3268_s24, %s2967_s13  ;;  %s2971_s15 = sshll.u32 %s3161_s14, 4  ;;  %s2972_s15 = int_to_ptr.vmem [resolvable:$false] %s2971_s15 }
  0x2e   : > { %s2973_s16 = scalar_lea.vmem %s2972_s15, 24576  ;;  %p2974_p0 = scmp.lt.s32.totalorder %s3268_s24, %s2972_s15 }
  0x2f   : > { %p2969_p11 = pnand %p2968_p10, %p2564_p12  ;;  %p2975_p2 = scmp.lt.s32.totalorder %s2973_s16, %s2967_s13 }
  0x31   : > { %p2970_p13 = pneg %p2969_p11  ;;  %p2976_p3 = por %p2975_p2, %p2974_p0 }
  0x33   : > { %p2977_p4 = pnand %p2976_p3, %p2970_p13 }
  0x35   : > { %2980 = shalt.err (!%p2977_p4)
}
  0x36   : > { %s3162_s26 = smov 3200   ;;  %s3163_s27 = smov 1024  }
  0x37   : > { %226 = dma.hbm_to_vmem [thread:$0]  (%p2564_p12), %s3265_s17, %s3254_s10, %s3268_s24, %s3257_s12, %s3162_s26, %s3163_s27, %s2566_s18  }
  0x38 PF: > { %p2569_p1 = scmp.ge.s32.totalorder %s3095_s23, 1  ;;  %p228_p5 = scmp.lt.s32.totalorder %s3095_s23, 5 }
  0x3a   : > { %p229_p6 = pnand %p2569_p1, %p228_p5 }
  0x3b   : > { %s3300_s6 = sand.u32 (!%p229_p6), 1, %s3079_s19  }
  0x3c   : > { %232 = sbr.rel (%p229_p6) target bundleno = 801 (0x321), region = 40  ;;  %s235_s8 = scalar_lea.sflag (!%p229_p6), [#allocation3], %s3300_s6 }
  0x3d   : > { %s2767_s7 = smul.u32 (!%p229_p6), 768, %s3300_s6 }
  0x3f   : > { %s3304_s11 = scalar_lea.vmem (!%p229_p6), [#allocation2], %s2767_s7 }
  0x43   : > { %3070 = dma.done.wait (%p3237_p8), %s235_s8, 12288  }
  0x44   : > { %3072 = vsyncadd (%p3237_p8), %s235_s8, 4294955008  ;;  %v3164_v0 = vmov 0   ;;  %v538_v1 = vld [vmem:[%s5036_s3] sm:$0xff]  ;;  %v539_v3 = vld [vmem:[%s5036_s3 + $0x8] sm:$0xff]  ;;  %v3165_v31 = vmov 0.0   ;;  %vm914_vm0 = vcmask 785408  }
  0x45   : > { %2952 = vset.pattern.permute.xlu1 %v3164_v0  ;;  %2951 = vset.pattern.permute.xlu0 %v3164_v0  ;;  %v370_v2 = vld [vmem:[%s5035_s2] sm:$0xff]  ;;  %v371_v4 = vld [vmem:[%s5035_s2 + $0x8] sm:$0xff]  ;;  %v373_v5 = vld [vmem:[%s5035_s2 + $0x18] sm:$0xff]  ;;  %s2636_s13 = sshll.u32 (%p3244_p9), %s3087_s21, 3  ;;  %s2665_s28 = sshll.u32 (%p3244_p9), %s3087_s21, 6 }
  0x46   : > { %552 = vperm.xlu1 %2952, %v538_v1   ;;  %384 = vperm.xlu0 %2951, %v370_v2   ;;  %v372_v6 = vld [vmem:[%s5035_s2 + $0x10] sm:$0xff]  ;;  %v541_v7 = vld [vmem:[%s5036_s3 + $0x18] sm:$0xff]  ;;  %v375_v9 = vld [vmem:[%s5035_s2 + $0x28] sm:$0xff]  ;;  %s1871_s14 = ssub.s32 (%p3244_p9), 25, %s2636_s13  ;;  %s4352_s26 = scalar_lea.vmem (%p3244_p9), %s5038_s5, %s2665_s28  }
  0x47   : > { %v540_v8 = vld [vmem:[%s5036_s3 + $0x10] sm:$0xff]  ;;  %v374_v10 = vld [vmem:[%s5035_s2 + $0x20] sm:$0xff]  ;;  %v543_v11 = vld [vmem:[%s5036_s3 + $0x28] sm:$0xff]  ;;  %1027 = vmatprep.mubr.f32.mxu0 %v3165_v31  ;;  %1188 = vmatprep.mubr.f32.mxu1 %v3165_v31  ;;  %p1872_p8 = scmp.lt.s32.totalorder (%p3244_p9), %s1871_s14, 8 }
  0x48   : > { %v542_v12 = vld [vmem:[%s5036_s3 + $0x20] sm:$0xff]  ;;  %v377_v13 = vld [vmem:[%s5035_s2 + $0x38] sm:$0xff]  ;;  %v376_v14 = vld [vmem:[%s5035_s2 + $0x30] sm:$0xff] }
  0x49   : > { %v545_v15 = vld [vmem:[%s5036_s3 + $0x38] sm:$0xff]  ;;  %v544_v16 = vld [vmem:[%s5036_s3 + $0x30] sm:$0xff]  ;;  %v379_v17 = vld [vmem:[%s5035_s2 + $0x48] sm:$0xff] }
  0x4a   : > { %557 = vperm.xlu1 %2952, %v539_v3   ;;  %389 = vperm.xlu0 %2951, %v371_v4   ;;  %v378_v18 = vld [vmem:[%s5035_s2 + $0x40] sm:$0xff]  ;;  %v547_v19 = vld [vmem:[%s5036_s3 + $0x48] sm:$0xff]  ;;  %v381_v21 = vld [vmem:[%s5035_s2 + $0x58] sm:$0xff] }
  0x4b   : > { %v546_v20 = vld [vmem:[%s5036_s3 + $0x40] sm:$0xff]  ;;  %v380_v22 = vld [vmem:[%s5035_s2 + $0x50] sm:$0xff]  ;;  %v549_v23 = vld [vmem:[%s5036_s3 + $0x58] sm:$0xff] }
  0x4c   : > { %v548_v24 = vld [vmem:[%s5036_s3 + $0x50] sm:$0xff]  ;;  %v819_v25 = vld [vmem:[%s5037_s4 + $0x8] sm:$0xff]  ;;  %v818_v26 = vld [vmem:[%s5037_s4] sm:$0xff] }
  0x4d   : > { %v821_v27 = vld [vmem:[%s5037_s4 + $0x18] sm:$0xff]  ;;  %v820_v28 = vld [vmem:[%s5037_s4 + $0x10] sm:$0xff]  ;;  %v823_v29 = vld [vmem:[%s5037_s4 + $0x28] sm:$0xff] }
  0x4e   : > { %399 = vperm.xlu1 %2952, %v373_v5   ;;  %394 = vperm.xlu0 %2951, %v372_v6   ;;  %v822_v30 = vld [vmem:[%s5037_s4 + $0x20] sm:$0xff]  ;;  %v825_v32 = vld [vmem:[%s5037_s4 + $0x38] sm:$0xff]  ;;  %v824_v33 = vld [vmem:[%s5037_s4 + $0x30] sm:$0xff] }
  0x4f   : > { %v827_v34 = vld [vmem:[%s5037_s4 + $0x48] sm:$0xff]  ;;  %v826_v35 = vld [vmem:[%s5037_s4 + $0x40] sm:$0xff]  ;;  %v829_v36 = vld [vmem:[%s5037_s4 + $0x58] sm:$0xff] }
  0x50   : > { %v828_v37 = vld [vmem:[%s5037_s4 + $0x50] sm:$0xff]  ;;  %v831_v38 = vld [vmem:[%s5037_s4 + $0x68] sm:$0xff]  ;;  %v830_v39 = vld [vmem:[%s5037_s4 + $0x60] sm:$0xff] }
  0x51   : > { %v833_v40 = vld [vmem:[%s5037_s4 + $0x78] sm:$0xff]  ;;  %v832_v41 = vld [vmem:[%s5037_s4 + $0x70] sm:$0xff]  ;;  %v275_v42 = vld [vmem:[%s3304_s11 + $0x8] sm:$0xff] }
  0x52   : > { %567 = vperm.xlu1 %2952, %v541_v7   ;;  %562 = vperm.xlu0 %2951, %v540_v8   ;;  %v277_v43 = vld [vmem:[%s3304_s11 + $0x18] sm:$0xff]  ;;  %v274_v44 = vld [vmem:[%s3304_s11] sm:$0xff]  ;;  %v276_v45 = vld [vmem:[%s3304_s11 + $0x10] sm:$0xff] }
  0x53   : > { %v279_v46 = vld [vmem:[%s3304_s11 + $0x28] sm:$0xff]  ;;  %v281_v47 = vld [vmem:[%s3304_s11 + $0x38] sm:$0xff]  ;;  %v278_v48 = vld [vmem:[%s3304_s11 + $0x20] sm:$0xff] }
  0x54   : > { %v280_v49 = vld [vmem:[%s3304_s11 + $0x30] sm:$0xff]  ;;  %v283_v56 = vld [vmem:[%s3304_s11 + $0x48] sm:$0xff]  ;;  %v285_v57 = vld [vmem:[%s3304_s11 + $0x58] sm:$0xff] }
  0x55   : > { %v282_v0 = vld [vmem:[%s3304_s11 + $0x40] sm:$0xff]  ;;  %v284_v2 = vld [vmem:[%s3304_s11 + $0x50] sm:$0xff] }
  0x56   : > { %409 = vperm.xlu1 %2952, %v375_v9   ;;  %404 = vperm.xlu0 %2951, %v374_v10   ;;  %v287_v10 = vld [vmem:[%s3304_s11 + $0x68] sm:$0xff] }
  0x5a   : > { %577 = vperm.xlu1 %2952, %v543_v11   ;;  %572 = vperm.xlu0 %2951, %v542_v12   ;;  %v289_v11 = vld [vmem:[%s3304_s11 + $0x78] sm:$0xff] }
  0x5e   : > { %419 = vperm.xlu1 %2952, %v377_v13   ;;  %414 = vperm.xlu0 %2951, %v376_v14  }
  0x62   : > { %587 = vperm.xlu1 %2952, %v545_v15   ;;  %582 = vperm.xlu0 %2951, %v544_v16  }
  0x66   : > { %429 = vperm.xlu1 %2952, %v379_v17   ;;  %424 = vperm.xlu0 %2951, %v378_v18   ;;  %v291_v18 = vld [vmem:[%s3304_s11 + $0x88] sm:$0xff] }
  0x6a   : > { %597 = vperm.xlu1 %2952, %v547_v19   ;;  %592 = vperm.xlu0 %2951, %v546_v20   ;;  %v299_v19 = vld [vmem:[%s3304_s11 + $0xc8] sm:$0xff] }
  0x6e   : > { %439 = vperm.xlu1 %2952, %v381_v21   ;;  %434 = vperm.xlu0 %2951, %v380_v22  }
  0x72   : > { %607 = vperm.xlu1 %2952, %v549_v23   ;;  %602 = vperm.xlu0 %2951, %v548_v24   ;;  %v293_v24 = vld [vmem:[%s3304_s11 + $0x98] sm:$0xff] }
  0x76   : > { %841 = vperm.xlu1 %2952, %v819_v25   ;;  %836 = vperm.xlu0 %2951, %v818_v26   ;;  %v301_v25 = vld [vmem:[%s3304_s11 + $0xd8] sm:$0xff] }
  0x7a   : > { %851 = vperm.xlu1 %2952, %v821_v27   ;;  %846 = vperm.xlu0 %2951, %v820_v28  }
  0x7e   : > { %861 = vperm.xlu1 %2952, %v823_v29   ;;  %856 = vperm.xlu0 %2951, %v822_v30   ;;  %v290_v30 = vld [vmem:[%s3304_s11 + $0x80] sm:$0xff] }
  0x82   : > { %871 = vperm.xlu1 %2952, %v825_v32   ;;  %866 = vperm.xlu0 %2951, %v824_v33   ;;  %v298_v32 = vld [vmem:[%s3304_s11 + $0xc0] sm:$0xff] }
  0x86   : > { %881 = vperm.xlu1 %2952, %v827_v34   ;;  %876 = vperm.xlu0 %2951, %v826_v35  }
  0x8a   : > { %891 = vperm.xlu1 %2952, %v829_v36   ;;  %886 = vperm.xlu0 %2951, %v828_v37  }
  0x8e   : > { %901 = vperm.xlu1 %2952, %v831_v38   ;;  %896 = vperm.xlu0 %2951, %v830_v39   ;;  %v292_v39 = vld [vmem:[%s3304_s11 + $0x90] sm:$0xff] }
  0x92   : > { %911 = vperm.xlu1 %2952, %v833_v40   ;;  %906 = vperm.xlu0 %2951, %v832_v41   ;;  %v300_v40 = vld [vmem:[%s3304_s11 + $0xd0] sm:$0xff] }
  0xc5   : > { %v553_v50 = vpop.permute.xlu1 %552  ;;  %v385_v51 = vpop.permute.xlu0 %384 }
  0xc6   : > { %v443_v52 = vmul.f32 %v385_v51, %v275_v42  ;;  %v445_v53 = vmul.f32 %v385_v51, %v277_v43  ;;  %v442_v54 = vmul.f32 %v385_v51, %v274_v44  ;;  %v444_v55 = vmul.f32 %v385_v51, %v276_v45 }
  0xc7   : > { %v447_v58 = vmul.f32 %v385_v51, %v279_v46  ;;  %v449_v59 = vmul.f32 %v385_v51, %v281_v47  ;;  %v446_v60 = vmul.f32 %v385_v51, %v278_v48  ;;  %v448_v61 = vmul.f32 %v385_v51, %v280_v49 }
  0xc8   : > { %v611_v62 = vadd.f32 %v553_v50, %v443_v52  ;;  %v613_v63 = vadd.f32 %v553_v50, %v445_v53  ;;  %v610_v1 = vadd.f32 %v553_v50, %v442_v54  ;;  %v612_v3 = vadd.f32 %v553_v50, %v444_v55 }
  0xc9   : > { %v3444_v4 = vpop.permute.xlu1 %557  ;;  %v3446_v5 = vpop.permute.xlu0 %389  ;;  %v3448_v6 = vadd.f32 %v553_v50, %v447_v58  ;;  %v3450_v7 = vadd.f32 %v553_v50, %v449_v59  ;;  %v3456_v12 = vadd.f32 %v553_v50, %v446_v60  ;;  %v3458_v13 = vadd.f32 %v553_v50, %v448_v61  ;;  %v307_v61 = vld [vmem:[%s3304_s11 + $0x108] sm:$0xff] }
  0xca   : > { %v451_v8 = vmul.f32 %v3446_v5, %v283_v56  ;;  %v453_v9 = vmul.f32 %v3446_v5, %v285_v57  ;;  %v707_v14 = vmax.f32 %v611_v62, 0.0  ;;  %v709_v15 = vmax.f32 %v613_v63, 0.0  ;;  %v315_v62 = vld [vmem:[%s3304_s11 + $0x148] sm:$0xff] }
  0xcb   : > { %v450_v16 = vmul.f32 %v3446_v5, %v282_v0  ;;  %v452_v17 = vmul.f32 %v3446_v5, %v284_v2  ;;  %v706_v22 = vmax.f32 %v610_v1, 0.0  ;;  %v708_v23 = vmax.f32 %v612_v3, 0.0  ;;  %v309_v3 = vld [vmem:[%s3304_s11 + $0x118] sm:$0xff] }
  0xcc   : > { %v619_v20 = vadd.f32 %v3444_v4, %v451_v8  ;;  %v621_v21 = vadd.f32 %v3444_v4, %v453_v9  ;;  %v3477_v33 = vmul.f32 %v3446_v5, %v287_v10  ;;  %v3480_v34 = vmul.f32 %v3446_v5, %v289_v11  ;;  %v317_v8 = vld [vmem:[%s3304_s11 + $0x158] sm:$0xff] }
  0xcd   : > { %v3468_v26 = vpop.permute.xlu1 %399  ;;  %v3470_v27 = vpop.permute.xlu0 %394  ;;  %v618_v28 = vadd.f32 %v3444_v4, %v450_v16  ;;  %v620_v29 = vadd.f32 %v3444_v4, %v452_v17  ;;  %v306_v17 = vld [vmem:[%s3304_s11 + $0x100] sm:$0xff] }
  0xce   : > { %v715_v35 = vmax.f32 %v619_v20, 0.0  ;;  %v717_v36 = vmax.f32 %v621_v21, 0.0  ;;  %v459_v37 = vmul.f32 %v3470_v27, %v291_v18  ;;  %v467_v38 = vmul.f32 %v3468_v26, %v299_v19  ;;  %v314_v18 = vld [vmem:[%s3304_s11 + $0x140] sm:$0xff]  ;;  %v308_v19 = vld [vmem:[%s3304_s11 + $0x110] sm:$0xff] }
  0xcf   : > { %v714_v41 = vmax.f32 %v618_v28, 0.0  ;;  %v716_v42 = vmax.f32 %v620_v29, 0.0  ;;  %v461_v43 = vmul.f32 %v3470_v27, %v293_v24  ;;  %v469_v44 = vmul.f32 %v3468_v26, %v301_v25  ;;  %v316_v24 = vld [vmem:[%s3304_s11 + $0x150] sm:$0xff] }
  0xd0   : > { %v2670_v45 = vpack.c.bf16 %v715_v35, %v707_v14  ;;  %v2694_v46 = vpack.c.bf16 %v717_v36, %v709_v15  ;;  %v458_v47 = vmul.f32 %v3470_v27, %v290_v30  ;;  %v466_v48 = vmul.f32 %v3468_v26, %v298_v32 }
  0xd1   : > { %v3490_v49 = vpop.permute.xlu1 %567  ;;  %v3492_v50 = vpop.permute.xlu0 %562  ;;  %v2672_v51 = vpack.c.bf16 %v714_v41, %v706_v22  ;;  %v2696_v52 = vpack.c.bf16 %v716_v42, %v708_v23  ;;  %v460_v53 = vmul.f32 %v3470_v27, %v292_v39  ;;  %v468_v54 = vmul.f32 %v3468_v26, %v300_v40 }
  0xd2   : > { %2671 = vmatprep.subr.bf16.mxu0 %v2670_v45  ;;  %2695 = vmatprep.subr.bf16.mxu1 %v2694_v46  ;;  %v627_v55 = vadd.f32 %v3492_v50, %v459_v37  ;;  %v635_v56 = vadd.f32 %v3490_v49, %v467_v38  ;;  %v629_v57 = vadd.f32 %v3492_v50, %v461_v43  ;;  %v711_v43 = vmax.f32 %v3448_v6, 0.0 }
  0xd3   : > { %2673 = vmatpush1.bf16.msra.mxu0 %v2672_v51  ;;  %2697 = vmatpush1.bf16.msra.mxu1 %v2696_v52  ;;  %v637_v58 = vadd.f32 %v3490_v49, %v469_v44  ;;  %v626_v59 = vadd.f32 %v3492_v50, %v458_v47  ;;  %v634_v60 = vadd.f32 %v3490_v49, %v466_v48 }
  0xd4   : > { %v723_v63 = vmax.f32 %v627_v55, 0.0  ;;  %v731_v0 = vmax.f32 %v635_v56, 0.0  ;;  %v725_v1 = vmax.f32 %v629_v57, 0.0  ;;  %v628_v2 = vadd.f32 %v3492_v50, %v460_v53  ;;  %v323_v53 = vld [vmem:[%s3304_s11 + $0x188] sm:$0xff]  ;;  %v325_v55 = vld [vmem:[%s3304_s11 + $0x198] sm:$0xff] }
  0xd5   : > { %v3507_v9 = vpop.permute.xlu1 %409  ;;  %v3509_v10 = vpop.permute.xlu0 %404  ;;  %v733_v11 = vmax.f32 %v637_v58, 0.0  ;;  %v722_v14 = vmax.f32 %v626_v59, 0.0  ;;  %v730_v15 = vmax.f32 %v634_v60, 0.0  ;;  %v636_v16 = vadd.f32 %v3490_v49, %v468_v54  ;;  %v331_v54 = vld [vmem:[%s3304_s11 + $0x1c8] sm:$0xff]  ;;  %v333_v60 = vld [vmem:[%s3304_s11 + $0x1d8] sm:$0xff] }
  0xd6   : > { %v2674_v20 = vpack.c.bf16 %v731_v0, %v723_v63  ;;  %v724_v21 = vmax.f32 %v628_v2, 0.0  ;;  %v475_v22 = vmul.f32 %v3509_v10, %v307_v61  ;;  %v483_v23 = vmul.f32 %v3507_v9, %v315_v62  ;;  %v322_v61 = vld [vmem:[%s3304_s11 + $0x180] sm:$0xff] }
  0xd7   : > { %v2698_v25 = vpack.c.bf16 %v733_v11, %v725_v1  ;;  %v2676_v28 = vpack.c.bf16 %v730_v15, %v722_v14  ;;  %v732_v29 = vmax.f32 %v636_v16, 0.0  ;;  %v477_v30 = vmul.f32 %v3509_v10, %v309_v3  ;;  %v324_v11 = vld [vmem:[%s3304_s11 + $0x190] sm:$0xff] }
  0xd8   : > { %2675 = vmatprep.subr.bf16.mxu0 %v2674_v20  ;;  %v485_v32 = vmul.f32 %v3507_v9, %v317_v8  ;;  %v474_v35 = vmul.f32 %v3509_v10, %v306_v17  ;;  %v482_v36 = vmul.f32 %v3507_v9, %v314_v18  ;;  %v476_v37 = vmul.f32 %v3509_v10, %v308_v19  ;;  %v330_v8 = vld [vmem:[%s3304_s11 + $0x1c0] sm:$0xff]  ;;  %v332_v18 = vld [vmem:[%s3304_s11 + $0x1d0] sm:$0xff] }
  0xd9   : > { %2699 = vmatprep.subr.bf16.mxu1 %v2698_v25  ;;  %v3523_v38 = vpop.permute.xlu1 %577  ;;  %v3525_v39 = vpop.permute.xlu0 %572  ;;  %2677 = vmatpush1.bf16.msra.mxu0 %v2676_v28  ;;  %v2700_v40 = vpack.c.bf16 %v732_v29, %v724_v21  ;;  %v484_v41 = vmul.f32 %v3507_v9, %v316_v24  ;;  %v3530_v42 = vadd.f32 %v3444_v4, %v3477_v33  ;;  %v286_v19 = vld [vmem:[%s3304_s11 + $0x60] sm:$0xff]  ;;  %v713_v29 = vmax.f32 %v3450_v7, 0.0 }
  0xda   : > { %v643_v44 = vadd.f32 %v3525_v39, %v475_v22  ;;  %v651_v45 = vadd.f32 %v3523_v38, %v483_v23  ;;  %v645_v46 = vadd.f32 %v3525_v39, %v477_v30  ;;  %v653_v47 = vadd.f32 %v3523_v38, %v485_v32 }
  0xdb   : > { %2701 = vmatpush1.bf16.msra.mxu1 %v2700_v40  ;;  %v642_v48 = vadd.f32 %v3525_v39, %v474_v35  ;;  %v650_v51 = vadd.f32 %v3523_v38, %v482_v36  ;;  %v644_v33 = vadd.f32 %v3525_v39, %v476_v37  ;;  %v652_v52 = vadd.f32 %v3523_v38, %v484_v41 }
  0xdc   : > { %v739_v56 = vmax.f32 %v643_v44, 0.0  ;;  %v747_v57 = vmax.f32 %v651_v45, 0.0  ;;  %v741_v58 = vmax.f32 %v645_v46, 0.0  ;;  %v749_v59 = vmax.f32 %v653_v47, 0.0 }
  0xdd   : > { %v3546_v62 = vpop.permute.xlu1 %419  ;;  %v3548_v63 = vpop.permute.xlu0 %414  ;;  %v738_v0 = vmax.f32 %v642_v48, 0.0  ;;  %v746_v1 = vmax.f32 %v650_v51, 0.0  ;;  %v740_v2 = vmax.f32 %v644_v33, 0.0  ;;  %v748_v3 = vmax.f32 %v652_v52, 0.0  ;;  %v339_v51 = vld [vmem:[%s3304_s11 + $0x208] sm:$0xff]  ;;  %v341_v52 = vld [vmem:[%s3304_s11 + $0x218] sm:$0xff] }
  0xde   : > { %v2678_v14 = vpack.c.bf16 %v747_v57, %v739_v56  ;;  %v2702_v15 = vpack.c.bf16 %v749_v59, %v741_v58  ;;  %v491_v16 = vmul.f32 %v3548_v63, %v323_v53  ;;  %v499_v17 = vmul.f32 %v3546_v62, %v331_v54  ;;  %v347_v33 = vld [vmem:[%s3304_s11 + $0x248] sm:$0xff]  ;;  %v349_v57 = vld [vmem:[%s3304_s11 + $0x258] sm:$0xff]  ;;  %v338_v58 = vld [vmem:[%s3304_s11 + $0x200] sm:$0xff] }
  0xdf   : > { %v2680_v20 = vpack.c.bf16 %v746_v1, %v738_v0  ;;  %v2704_v21 = vpack.c.bf16 %v748_v3, %v740_v2  ;;  %v493_v22 = vmul.f32 %v3548_v63, %v325_v55  ;;  %v501_v23 = vmul.f32 %v3546_v62, %v333_v60  ;;  %v346_v3 = vld [vmem:[%s3304_s11 + $0x240] sm:$0xff] }
  0xe0   : > { %2679 = vmatprep.subr.bf16.mxu0 %v2678_v14  ;;  %2703 = vmatprep.subr.bf16.mxu1 %v2702_v15  ;;  %v490_v24 = vmul.f32 %v3548_v63, %v322_v61  ;;  %v498_v25 = vmul.f32 %v3546_v62, %v330_v8  ;;  %v492_v28 = vmul.f32 %v3548_v63, %v324_v11  ;;  %v719_v36 = vmax.f32 %v3530_v42, 0.0  ;;  %v340_v8 = vld [vmem:[%s3304_s11 + $0x210] sm:$0xff] }
  0xe1   : > { %v3562_v30 = vpop.permute.xlu1 %587  ;;  %v3564_v32 = vpop.permute.xlu0 %582  ;;  %2681 = vmatpush1.bf16.msra.mxu0 %v2680_v20  ;;  %2705 = vmatpush1.bf16.msra.mxu1 %v2704_v21  ;;  %v500_v35 = vmul.f32 %v3546_v62, %v332_v18  ;;  %v3570_v37 = vadd.f32 %v3444_v4, %v3480_v34  ;;  %v454_v40 = vmul.f32 %v3446_v5, %v286_v19 }
  0xe2   : > { %v659_v41 = vadd.f32 %v3564_v32, %v491_v16  ;;  %v667_v44 = vadd.f32 %v3562_v30, %v499_v17  ;;  %v661_v45 = vadd.f32 %v3564_v32, %v493_v22  ;;  %v669_v46 = vadd.f32 %v3562_v30, %v501_v23  ;;  %v348_v17 = vld [vmem:[%s3304_s11 + $0x250] sm:$0xff] }
  0xe3   : > { %v658_v47 = vadd.f32 %v3564_v32, %v490_v24  ;;  %v666_v42 = vadd.f32 %v3562_v30, %v498_v25  ;;  %v660_v48 = vadd.f32 %v3564_v32, %v492_v28  ;;  %v668_v34 = vadd.f32 %v3562_v30, %v500_v35 }
  0xe4   : > { %v755_v53 = vmax.f32 %v659_v41, 0.0  ;;  %v763_v54 = vmax.f32 %v667_v44, 0.0  ;;  %v757_v55 = vmax.f32 %v661_v45, 0.0  ;;  %v765_v56 = vmax.f32 %v669_v46, 0.0 }
  0xe5   : > { %v3586_v59 = vpop.permute.xlu1 %429  ;;  %v3588_v60 = vpop.permute.xlu0 %424  ;;  %v754_v61 = vmax.f32 %v658_v47, 0.0  ;;  %v762_v0 = vmax.f32 %v666_v42, 0.0  ;;  %v756_v1 = vmax.f32 %v660_v48, 0.0  ;;  %v764_v2 = vmax.f32 %v668_v34, 0.0 }
  0xe6   : > { %v2682_v11 = vpack.c.bf16 %v763_v54, %v755_v53  ;;  %v2706_v14 = vpack.c.bf16 %v765_v56, %v757_v55  ;;  %v507_v15 = vmul.f32 %v3588_v60, %v339_v51  ;;  %v515_v16 = vmul.f32 %v3586_v59, %v347_v33  ;;  %v357_v33 = vld [vmem:[%s3304_s11 + $0x298] sm:$0xff] }
  0xe7   : > { %v2684_v18 = vpack.c.bf16 %v762_v0, %v754_v61  ;;  %v2708_v19 = vpack.c.bf16 %v764_v2, %v756_v1  ;;  %v509_v20 = vmul.f32 %v3588_v60, %v341_v52  ;;  %v517_v21 = vmul.f32 %v3586_v59, %v349_v57  ;;  %v365_v56 = vld [vmem:[%s3304_s11 + $0x2d8] sm:$0xff]  ;;  %v354_v57 = vld [vmem:[%s3304_s11 + $0x280] sm:$0xff] }
  0xe8   : > { %2683 = vmatprep.subr.bf16.mxu0 %v2682_v11  ;;  %2707 = vmatprep.subr.bf16.mxu1 %v2706_v14  ;;  %v506_v22 = vmul.f32 %v3588_v60, %v338_v58  ;;  %v514_v23 = vmul.f32 %v3586_v59, %v346_v3  ;;  %v508_v24 = vmul.f32 %v3588_v60, %v340_v8  ;;  %v710_v25 = vmax.f32 %v3456_v12, 0.0  ;;  %v362_v8 = vld [vmem:[%s3304_s11 + $0x2c0] sm:$0xff]  ;;  %v356_v11 = vld [vmem:[%s3304_s11 + $0x290] sm:$0xff] }
  0xe9   : > { %v3601_v28 = vpop.permute.xlu1 %597  ;;  %v3603_v35 = vpop.permute.xlu0 %592  ;;  %2685 = vmatpush1.bf16.msra.mxu0 %v2684_v18  ;;  %2709 = vmatpush1.bf16.msra.mxu1 %v2708_v19  ;;  %v516_v41 = vmul.f32 %v3586_v59, %v348_v17  ;;  %v3608_v44 = vpack.c.bf16 %v719_v36, %v711_v43  ;;  %v721_v45 = vmax.f32 %v3570_v37, 0.0  ;;  %v3612_v46 = vadd.f32 %v3444_v4, %v454_v40  ;;  %v355_v37 = vld [vmem:[%s3304_s11 + $0x288] sm:$0xff]  ;;  %v364_v18 = vld [vmem:[%s3304_s11 + $0x2d0] sm:$0xff] }
  0xea   : > { %v675_v47 = vadd.f32 %v3603_v35, %v507_v15  ;;  %v683_v42 = vadd.f32 %v3601_v28, %v515_v16  ;;  %v677_v48 = vadd.f32 %v3603_v35, %v509_v20  ;;  %v685_v34 = vadd.f32 %v3601_v28, %v517_v21  ;;  %v363_v40 = vld [vmem:[%s3304_s11 + $0x2c8] sm:$0xff]  ;;  %v288_v19 = vld [vmem:[%s3304_s11 + $0x70] sm:$0xff] }
  0xeb   : > { %v674_v51 = vadd.f32 %v3603_v35, %v506_v22  ;;  %v682_v6 = vadd.f32 %v3601_v28, %v514_v23  ;;  %v676_v43 = vadd.f32 %v3603_v35, %v508_v24  ;;  %v684_v36 = vadd.f32 %v3601_v28, %v516_v41 }
  0xec   : > { %v771_v52 = vmax.f32 %v675_v47, 0.0  ;;  %v779_v53 = vmax.f32 %v683_v42, 0.0  ;;  %v773_v54 = vmax.f32 %v677_v48, 0.0  ;;  %v781_v55 = vmax.f32 %v685_v34, 0.0 }
  0xed   : > { %v3627_v58 = vpop.permute.xlu1 %439  ;;  %v3629_v61 = vpop.permute.xlu0 %434  ;;  %v770_v0 = vmax.f32 %v674_v51, 0.0  ;;  %v778_v1 = vmax.f32 %v682_v6, 0.0  ;;  %v772_v2 = vmax.f32 %v676_v43, 0.0  ;;  %v780_v3 = vmax.f32 %v684_v36, 0.0 }
  0xee   : > { %v2686_v14 = vpack.c.bf16 %v779_v53, %v771_v52  ;;  %v2710_v15 = vpack.c.bf16 %v781_v55, %v773_v54  ;;  %v523_v16 = vmul.f32 %v3629_v61, %v355_v37  ;;  %v531_v17 = vmul.f32 %v3627_v58, %v363_v40 }
  0xef   : > { %v2688_v20 = vpack.c.bf16 %v778_v1, %v770_v0  ;;  %v2712_v21 = vpack.c.bf16 %v780_v3, %v772_v2  ;;  %v525_v22 = vmul.f32 %v3629_v61, %v357_v33  ;;  %v533_v23 = vmul.f32 %v3627_v58, %v365_v56  ;;  %v303_v56 = vld [vmem:[%s3304_s11 + $0xe8] sm:$0xff] }
  0xf0   : > { %2687 = vmatprep.subr.bf16.mxu0 %v2686_v14  ;;  %2711 = vmatprep.subr.bf16.mxu1 %v2710_v15  ;;  %v522_v24 = vmul.f32 %v3629_v61, %v354_v57  ;;  %v530_v41 = vmul.f32 %v3627_v58, %v362_v8  ;;  %v524_v47 = vmul.f32 %v3629_v61, %v356_v11  ;;  %v712_v42 = vmax.f32 %v3458_v13, 0.0  ;;  %v297_v57 = vld [vmem:[%s3304_s11 + $0xb8] sm:$0xff]  ;;  %v294_v11 = vld [vmem:[%s3304_s11 + $0xa0] sm:$0xff] }
  0xf1   : > { %v3643_v48 = vpop.permute.xlu1 %607  ;;  %v3645_v34 = vpop.permute.xlu0 %602  ;;  %2689 = vmatpush1.bf16.msra.mxu0 %v2688_v20  ;;  %2713 = vmatpush1.bf16.msra.mxu1 %v2712_v21  ;;  %v532_v51 = vmul.f32 %v3627_v58, %v364_v18  ;;  %v2742_v6 = vpack.c.bf16 %v721_v45, %v713_v29  ;;  %v718_v43 = vmax.f32 %v3612_v46, 0.0  ;;  %v456_v36 = vmul.f32 %v3446_v5, %v288_v19  ;;  %v295_v46 = vld [vmem:[%s3304_s11 + $0xa8] sm:$0xff]  ;;  %v305_v8 = vld [vmem:[%s3304_s11 + $0xf8] sm:$0xff]  ;;  %v302_v18 = vld [vmem:[%s3304_s11 + $0xe0] sm:$0xff] }
  0xf2   : > { %v691_v13 = vadd.f32 %v3645_v34, %v523_v16  ;;  %v699_v37 = vadd.f32 %v3643_v48, %v531_v17  ;;  %v693_v40 = vadd.f32 %v3645_v34, %v525_v22  ;;  %v701_v33 = vadd.f32 %v3643_v48, %v533_v23 }
  0xf3   : > { %v690_v52 = vadd.f32 %v3645_v34, %v522_v24  ;;  %v698_v7 = vadd.f32 %v3643_v48, %v530_v41  ;;  %v692_v29 = vadd.f32 %v3645_v34, %v524_v47  ;;  %v700_v45 = vadd.f32 %v3643_v48, %v532_v51 }
  0xf4   : > { %v787_v5 = vmax.f32 %v691_v13, 0.0  ;;  %v795_v53 = vmax.f32 %v699_v37, 0.0  ;;  %v789_v54 = vmax.f32 %v693_v40, 0.0  ;;  %v797_v55 = vmax.f32 %v701_v33, 0.0  ;;  %v311_v33 = vld [vmem:[%s3304_s11 + $0x128] sm:$0xff] }
  0xf5   : > { %v786_v0 = vmax.f32 %v690_v52, 0.0  ;;  %v794_v1 = vmax.f32 %v698_v7, 0.0  ;;  %v788_v2 = vmax.f32 %v692_v29, 0.0  ;;  %v796_v3 = vmax.f32 %v700_v45, 0.0 }
  0xf6   : > { %v2690_v14 = vpack.c.bf16 %v795_v53, %v787_v5  ;;  %v2714_v15 = vpack.c.bf16 %v797_v55, %v789_v54  ;;  %v2720_v16 = vpack.c.bf16 %v718_v43, %v710_v25  ;;  %v624_v17 = vadd.f32 %v3444_v4, %v456_v36  ;;  %v3677_v4 = vld [vmem:[%s5034_s1] sm:$0xff]  ;;  %v296_v43 = vld [vmem:[%s3304_s11 + $0xb0] sm:$0xff]  ;;  %v319_v5 = vld [vmem:[%s3304_s11 + $0x168] sm:$0xff] }
  0xf7   : > { %v2692_v19 = vpack.c.bf16 %v794_v1, %v786_v0  ;;  %v2716_v20 = vpack.c.bf16 %v796_v3, %v788_v2  ;;  %v463_v21 = vmul.f32 %v3470_v27, %v295_v46  ;;  %v471_v22 = vmul.f32 %v3468_v26, %v303_v56  ;;  %v304_v36 = vld [vmem:[%s3304_s11 + $0xf0] sm:$0xff]  ;;  %v313_v53 = vld [vmem:[%s3304_s11 + $0x138] sm:$0xff]  ;;  %v3701_v55 = vld [vmem:[%s5034_s1 + $0x8] sm:$0xff] }
  0xf8   : > { %2691 = vmatprep.subr.bf16.mxu0 %v2690_v14  ;;  %2715 = vmatprep.subr.bf16.mxu1 %v2714_v15  ;;  %v720_v23 = vmax.f32 %v624_v17, 0.0  ;;  %v465_v24 = vmul.f32 %v3470_v27, %v297_v57  ;;  %v473_v41 = vmul.f32 %v3468_v26, %v305_v8  ;;  %v462_v12 = vmul.f32 %v3470_v27, %v294_v11  ;;  %v321_v1 = vld [vmem:[%s3304_s11 + $0x178] sm:$0xff]  ;;  %v310_v2 = vld [vmem:[%s3304_s11 + $0x120] sm:$0xff] }
  0xf9   : > { %2693 = vmatpush1.bf16.msra.mxu0 %v2692_v19  ;;  %2717 = vmatpush1.bf16.msra.mxu1 %v2716_v20  ;;  %v631_v25 = vadd.f32 %v3492_v50, %v463_v21  ;;  %v639_v47 = vadd.f32 %v3490_v49, %v471_v22  ;;  %v470_v51 = vmul.f32 %v3468_v26, %v302_v18  ;;  %v318_v8 = vld [vmem:[%s3304_s11 + $0x160] sm:$0xff]  ;;  %v312_v19 = vld [vmem:[%s3304_s11 + $0x130] sm:$0xff] }
  0xfa   : > { %2719 = vmatprep.subr.bf16.mxu0 %v3608_v44  ;;  %2743 = vmatprep.subr.bf16.mxu1 %v2742_v6  ;;  %v2744_v13 = vpack.c.bf16 %v720_v23, %v712_v42  ;;  %v633_v37 = vadd.f32 %v3492_v50, %v465_v24  ;;  %v641_v40 = vadd.f32 %v3490_v49, %v473_v41  ;;  %v3726_v23 = vld [vmem:[%s5034_s1 + $0x10] sm:$0xff] }
  0xfb   : > { %v727_v52 = vmax.f32 %v631_v25, 0.0  ;;  %v735_v7 = vmax.f32 %v639_v47, 0.0  ;;  %v630_v29 = vadd.f32 %v3492_v50, %v462_v12  ;;  %v638_v45 = vadd.f32 %v3490_v49, %v470_v51  ;;  %v320_v41 = vld [vmem:[%s3304_s11 + $0x170] sm:$0xff]  ;;  %v327_v12 = vld [vmem:[%s3304_s11 + $0x1a8] sm:$0xff] }
  0xfc   : > { %2571 = vmatmul.mubr.msk.f32.vlgmr.msra.gmra.mrb[0].mxu0 %vm914_vm0, %v3677_v4  ;;  %2587 = vmatmul.mubr.msk.f32.vlgmr.msra.gmra.mrb[0].mxu1 %vm914_vm0, %v3677_v4  ;;  %v729_v44 = vmax.f32 %v633_v37, 0.0  ;;  %v737_v42 = vmax.f32 %v641_v40, 0.0  ;;  %v464_v6 = vmul.f32 %v3470_v27, %v296_v43  ;;  %v472_v46 = vmul.f32 %v3468_v26, %v304_v36  ;;  %v335_v43 = vld [vmem:[%s3304_s11 + $0x1e8] sm:$0xff] }
  0xfd   : > { %2721 = vmatpush1.bf16.msra.mxu0 %v2720_v16  ;;  %2745 = vmatpush1.bf16.msra.mxu1 %v2744_v13  ;;  %v2722_v54 = vpack.c.bf16 %v735_v7, %v727_v52  ;;  %v726_v56 = vmax.f32 %v630_v29, 0.0  ;;  %v734_v57 = vmax.f32 %v638_v45, 0.0  ;;  %v479_v0 = vmul.f32 %v3509_v10, %v311_v33  ;;  %v329_v33 = vld [vmem:[%s3304_s11 + $0x1b8] sm:$0xff] }
  0xfe   : > { %v2746_v27 = vpack.c.bf16 %v737_v42, %v729_v44  ;;  %1033 = vmatprep.mubr.f32.mxu0 %v3165_v31  ;;  %1194 = vmatprep.mubr.f32.mxu1 %v3165_v31  ;;  %v632_v26 = vadd.f32 %v3492_v50, %v464_v6  ;;  %v640_v3 = vadd.f32 %v3490_v49, %v472_v46  ;;  %v337_v44 = vld [vmem:[%s3304_s11 + $0x1f8] sm:$0xff] }
  0xff   : > { %2723 = vmatprep.subr.bf16.mxu0 %v2722_v54  ;;  %v2724_v11 = vpack.c.bf16 %v734_v57, %v726_v56  ;;  %v487_v14 = vmul.f32 %v3507_v9, %v319_v5  ;;  %v647_v15 = vadd.f32 %v3525_v39, %v479_v0  ;;  %v481_v16 = vmul.f32 %v3509_v10, %v313_v53  ;;  %v326_v5 = vld [vmem:[%s3304_s11 + $0x1a0] sm:$0xff]  ;;  %v328_v0 = vld [vmem:[%s3304_s11 + $0x1b0] sm:$0xff] }
 0x100   : > { %2747 = vmatprep.subr.bf16.mxu1 %v2746_v27  ;;  %2572 = vmatmul.mubr.msk.f32.gmra.mrb[2].mxu0 %vm914_vm0, %v3701_v55  ;;  %v728_v17 = vmax.f32 %v632_v26, 0.0  ;;  %v736_v18 = vmax.f32 %v640_v3, 0.0  ;;  %v489_v50 = vmul.f32 %v3507_v9, %v321_v1  ;;  %v478_v49 = vmul.f32 %v3509_v10, %v310_v2  ;;  %v336_v3 = vld [vmem:[%s3304_s11 + $0x1f0] sm:$0xff] }
 0x101   : > { %2588 = vmatmul.mubr.msk.f32.gmra.mrb[2].mxu1 %vm914_vm0, %v3701_v55  ;;  %2725 = vmatpush1.bf16.msra.mxu0 %v2724_v11  ;;  %v655_v20 = vadd.f32 %v3523_v38, %v487_v14  ;;  %v743_v21 = vmax.f32 %v647_v15, 0.0  ;;  %v649_v22 = vadd.f32 %v3525_v39, %v481_v16  ;;  %v486_v24 = vmul.f32 %v3507_v9, %v318_v8 }
 0x102   : > { %v2748_v25 = vpack.c.bf16 %v736_v18, %v728_v17  ;;  %v657_v47 = vadd.f32 %v3523_v38, %v489_v50  ;;  %1039 = vmatprep.mubr.f32.mxu0 %v3165_v31  ;;  %1200 = vmatprep.mubr.f32.mxu1 %v3165_v31  ;;  %v646_v51 = vadd.f32 %v3525_v39, %v478_v49  ;;  %v343_v50 = vld [vmem:[%s3304_s11 + $0x228] sm:$0xff] }
 0x103   : > { %v751_v36 = vmax.f32 %v655_v20, 0.0  ;;  %v745_v13 = vmax.f32 %v649_v22, 0.0  ;;  %v654_v37 = vadd.f32 %v3523_v38, %v486_v24  ;;  %v480_v40 = vmul.f32 %v3509_v10, %v312_v19  ;;  %v351_v49 = vld [vmem:[%s3304_s11 + $0x268] sm:$0xff]  ;;  %v3778_v19 = vld [vmem:[%s5034_s1 + $0x20] sm:$0xff] }
 0x104   : > { %2749 = vmatpush1.bf16.msra.mxu1 %v2748_v25  ;;  %v753_v52 = vmax.f32 %v657_v47, 0.0  ;;  %2573 = vmatmul.mubr.msk.f32.gmra.mrb[4].mxu0 %vm914_vm0, %v3726_v23  ;;  %v742_v7 = vmax.f32 %v646_v51, 0.0  ;;  %v488_v29 = vmul.f32 %v3507_v9, %v320_v41  ;;  %v495_v45 = vmul.f32 %v3548_v63, %v327_v12  ;;  %v3752_v9 = vld [vmem:[%s5034_s1 + $0x18] sm:$0xff] }
 0x105   : > { %v2726_v42 = vpack.c.bf16 %v751_v36, %v743_v21  ;;  %2589 = vmatmul.mubr.msk.f32.gmra.mrb[4].mxu1 %vm914_vm0, %v3726_v23  ;;  %v750_v10 = vmax.f32 %v654_v37, 0.0  ;;  %v648_v6 = vadd.f32 %v3525_v39, %v480_v40  ;;  %v503_v46 = vmul.f32 %v3546_v62, %v335_v43  ;;  %1045 = vmatprep.mubr.f32.mxu0 %v3165_v31  ;;  %v334_v39 = vld [vmem:[%s3304_s11 + $0x1e0] sm:$0xff]  ;;  %v345_v41 = vld [vmem:[%s3304_s11 + $0x238] sm:$0xff] }
 0x106   : > { %v2750_v53 = vpack.c.bf16 %v753_v52, %v745_v13  ;;  %v656_v54 = vadd.f32 %v3523_v38, %v488_v29  ;;  %v663_v56 = vadd.f32 %v3564_v32, %v495_v45  ;;  %v497_v57 = vmul.f32 %v3548_v63, %v329_v33  ;;  %1206 = vmatprep.mubr.f32.mxu1 %v3165_v31  ;;  %v353_v51 = vld [vmem:[%s3304_s11 + $0x278] sm:$0xff]  ;;  %v342_v37 = vld [vmem:[%s3304_s11 + $0x220] sm:$0xff] }
 0x107   : > { %2727 = vmatprep.subr.bf16.mxu0 %v2726_v42  ;;  %v2728_v1 = vpack.c.bf16 %v750_v10, %v742_v7  ;;  %v744_v2 = vmax.f32 %v648_v6, 0.0  ;;  %v671_v27 = vadd.f32 %v3562_v30, %v503_v46  ;;  %v505_v26 = vmul.f32 %v3546_v62, %v337_v44  ;;  %v350_v40 = vld [vmem:[%s3304_s11 + $0x260] sm:$0xff]  ;;  %v344_v10 = vld [vmem:[%s3304_s11 + $0x230] sm:$0xff] }
 0x108   : > { %2751 = vmatprep.subr.bf16.mxu1 %v2750_v53  ;;  %v752_v38 = vmax.f32 %v656_v54, 0.0  ;;  %v759_v8 = vmax.f32 %v663_v56, 0.0  ;;  %v665_v11 = vadd.f32 %v3564_v32, %v497_v57  ;;  %2574 = vmatmul.mubr.msk.f32.gmra.mrb[6].mxu0 %vm914_vm0, %v3752_v9  ;;  %v494_v14 = vmul.f32 %v3548_v63, %v326_v5  ;;  %v352_v54 = vld [vmem:[%s3304_s11 + $0x270] sm:$0xff]  ;;  %v359_v56 = vld [vmem:[%s3304_s11 + $0x2a8] sm:$0xff] }
 0x109   : > { %2729 = vmatpush1.bf16.msra.mxu0 %v2728_v1  ;;  %v767_v15 = vmax.f32 %v671_v27, 0.0  ;;  %v673_v16 = vadd.f32 %v3562_v30, %v505_v26  ;;  %2590 = vmatmul.mubr.msk.f32.gmra.mrb[6].mxu1 %vm914_vm0, %v3752_v9  ;;  %v502_v17 = vmul.f32 %v3546_v62, %v334_v39  ;;  %v496_v18 = vmul.f32 %v3548_v63, %v328_v0 }
 0x10a   : > { %v2752_v20 = vpack.c.bf16 %v752_v38, %v744_v2  ;;  %v761_v21 = vmax.f32 %v665_v11, 0.0  ;;  %v662_v22 = vadd.f32 %v3564_v32, %v494_v14  ;;  %v504_v24 = vmul.f32 %v3546_v62, %v336_v3  ;;  %1051 = vmatprep.mubr.f32.mxu0 %v3165_v31  ;;  %1212 = vmatprep.mubr.f32.mxu1 %v3165_v31  ;;  %v367_v2 = vld [vmem:[%s3304_s11 + $0x2e8] sm:$0xff] }
 0x10b   : > { %v2730_v63 = vpack.c.bf16 %v767_v15, %v759_v8  ;;  %v769_v12 = vmax.f32 %v673_v16, 0.0  ;;  %v670_v25 = vadd.f32 %v3562_v30, %v502_v17  ;;  %v664_v47 = vadd.f32 %v3564_v32, %v496_v18  ;;  %v361_v8 = vld [vmem:[%s3304_s11 + $0x2b8] sm:$0xff] }
 0x10c   : > { %2753 = vmatpush1.bf16.msra.mxu1 %v2752_v20  ;;  %v758_v43 = vmax.f32 %v662_v22, 0.0  ;;  %v672_v36 = vadd.f32 %v3562_v30, %v504_v24  ;;  %v511_v13 = vmul.f32 %v3588_v60, %v343_v50  ;;  %v519_v62 = vmul.f32 %v3586_v59, %v351_v49  ;;  %2575 = vmatmul.mubr.msk.f32.gmra.mrb[8].mxu0 %vm914_vm0, %v3778_v19  ;;  %v3801_v30 = vld [vmem:[%s5034_s1 + $0x28] sm:$0xff]  ;;  %v369_v17 = vld [vmem:[%s3304_s11 + $0x2f8] sm:$0xff] }
 0x10d   : > { %2731 = vmatprep.subr.bf16.mxu0 %v2730_v63  ;;  %v2754_v33 = vpack.c.bf16 %v769_v12, %v761_v21  ;;  %v766_v52 = vmax.f32 %v670_v25, 0.0  ;;  %v760_v7 = vmax.f32 %v664_v47, 0.0  ;;  %v513_v32 = vmul.f32 %v3588_v60, %v345_v41  ;;  %2591 = vmatmul.mubr.msk.f32.gmra.mrb[8].mxu1 %vm914_vm0, %v3778_v19  ;;  %v366_v63 = vld [vmem:[%s3304_s11 + $0x2e0] sm:$0xff]  ;;  %v360_v12 = vld [vmem:[%s3304_s11 + $0x2b0] sm:$0xff] }
 0x10e   : > { %v768_v29 = vmax.f32 %v672_v36, 0.0  ;;  %v679_v45 = vadd.f32 %v3603_v35, %v511_v13  ;;  %v687_v44 = vadd.f32 %v3601_v28, %v519_v62  ;;  %v521_v42 = vmul.f32 %v3586_v59, %v353_v51  ;;  %1057 = vmatprep.mubr.f32.mxu0 %v3165_v31  ;;  %1218 = vmatprep.mubr.f32.mxu1 %v3165_v31 }
 0x10f   : > { %2755 = vmatprep.subr.bf16.mxu1 %v2754_v33  ;;  %v2732_v6 = vpack.c.bf16 %v766_v52, %v758_v43  ;;  %v681_v46 = vadd.f32 %v3603_v35, %v513_v32  ;;  %v510_v5 = vmul.f32 %v3588_v60, %v342_v37  ;;  %v518_v53 = vmul.f32 %v3586_v59, %v350_v40  ;;  %v368_v43 = vld [vmem:[%s3304_s11 + $0x2f0] sm:$0xff]  ;;  %v3855_v37 = vld [vmem:[%s5034_s1 + $0x38] sm:$0xff] }
 0x110   : > { %v2756_v57 = vpack.c.bf16 %v768_v29, %v760_v7  ;;  %v775_v39 = vmax.f32 %v679_v45, 0.0  ;;  %v783_v0 = vmax.f32 %v687_v44, 0.0  ;;  %v689_v1 = vadd.f32 %v3601_v28, %v521_v42  ;;  %2576 = vmatmul.mubr.msk.f32.gmra.mrb[10].mxu0 %vm914_vm0, %v3801_v30 }
 0x111   : > { %2733 = vmatpush1.bf16.msra.mxu0 %v2732_v6  ;;  %v777_v27 = vmax.f32 %v681_v46, 0.0  ;;  %v678_v26 = vadd.f32 %v3603_v35, %v510_v5  ;;  %v686_v3 = vadd.f32 %v3601_v28, %v518_v53  ;;  %v512_v38 = vmul.f32 %v3588_v60, %v344_v10  ;;  %2592 = vmatmul.mubr.msk.f32.gmra.mrb[10].mxu1 %vm914_vm0, %v3801_v30  ;;  %v3831_v60 = vld [vmem:[%s5034_s1 + $0x30] sm:$0xff] }
 0x112   : > { %2757 = vmatpush1.bf16.msra.mxu1 %v2756_v57  ;;  %v2734_v11 = vpack.c.bf16 %v783_v0, %v775_v39  ;;  %v785_v14 = vmax.f32 %v689_v1, 0.0  ;;  %v520_v15 = vmul.f32 %v3586_v59, %v352_v54  ;;  %v527_v16 = vmul.f32 %v3629_v61, %v359_v56  ;;  %1063 = vmatprep.mubr.f32.mxu0 %v3165_v31  ;;  %v358_v59 = vld [vmem:[%s3304_s11 + $0x2a0] sm:$0xff]  ;;  %v3885_v39 = vld [vmem:[%s5034_s1 + $0x48] sm:$0xff]  ;;  %v3896_v0 = vld [vmem:[%s5034_s1 + $0x50] sm:$0xff]  ;;  %s2570_s11 = sshll.u32 %s3300_s6, 10 }
 0x113   : > { %v774_v18 = vmax.f32 %v678_v26, 0.0  ;;  %v782_v50 = vmax.f32 %v686_v3, 0.0  ;;  %v680_v49 = vadd.f32 %v3603_v35, %v512_v38  ;;  %v535_v20 = vmul.f32 %v3627_v58, %v367_v2  ;;  %1224 = vmatprep.mubr.f32.mxu1 %v3165_v31  ;;  %v3907_v1 = vld [vmem:[%s5034_s1 + $0x58] sm:$0xff]  ;;  %v3918_v2 = vld [vmem:[%s5034_s1 + $0x60] sm:$0xff]  ;;  %v3940_v26 = vld [vmem:[%s5034_s1 + $0x70] sm:$0xff]  ;;  %s4063_s6 = scalar_lea.vmem [#allocation4], %s2570_s11  }
 0x114   : > { %2735 = vmatprep.subr.bf16.mxu0 %v2734_v11  ;;  %v2758_v21 = vpack.c.bf16 %v785_v14, %v777_v27  ;;  %v688_v22 = vadd.f32 %v3601_v28, %v520_v15  ;;  %v695_v24 = vadd.f32 %v3645_v34, %v527_v16  ;;  %v529_v41 = vmul.f32 %v3629_v61, %v361_v8  ;;  %v3929_v27 = vld [vmem:[%s5034_s1 + $0x68] sm:$0xff]  ;;  %v3951_v3 = vld [vmem:[%s5034_s1 + $0x78] sm:$0xff]  ;;  %v4061_v15 = vpop.permute.xlu1 %841 }
 0x115   : > { %v2736_v25 = vpack.c.bf16 %v782_v50, %v774_v18  ;;  %v776_v47 = vmax.f32 %v680_v49, 0.0  ;;  %v703_v51 = vadd.f32 %v3643_v48, %v535_v20  ;;  %v537_v35 = vmul.f32 %v3627_v58, %v369_v17  ;;  %2577 = vmatmul.mubr.msk.f32.gmra.mrb[12].mxu0 %vm914_vm0, %v3831_v60  ;;  %2593 = vmatmul.mubr.msk.f32.gmra.mrb[12].mxu1 %vm914_vm0, %v3831_v60 }
 0x116   : > { %2759 = vmatprep.subr.bf16.mxu1 %v2758_v21  ;;  %v784_v28 = vmax.f32 %v688_v22, 0.0  ;;  %v791_v36 = vmax.f32 %v695_v24, 0.0  ;;  %v697_v13 = vadd.f32 %v3645_v34, %v529_v41  ;;  %v526_v62 = vmul.f32 %v3629_v61, %v358_v59  ;;  %1069 = vmatprep.mubr.f32.mxu0 %v3165_v31 }
 0x117   : > { %2737 = vmatpush1.bf16.msra.mxu0 %v2736_v25  ;;  %v799_v40 = vmax.f32 %v703_v51, 0.0  ;;  %v705_v33 = vadd.f32 %v3643_v48, %v537_v35  ;;  %v534_v52 = vmul.f32 %v3627_v58, %v366_v63  ;;  %v528_v7 = vmul.f32 %v3629_v61, %v360_v12  ;;  %1230 = vmatprep.mubr.f32.mxu1 %v3165_v31 }
 0x118   : > { %v2760_v32 = vpack.c.bf16 %v784_v28, %v776_v47  ;;  %v793_v29 = vmax.f32 %v697_v13, 0.0  ;;  %v694_v45 = vadd.f32 %v3645_v34, %v526_v62  ;;  %v536_v44 = vmul.f32 %v3627_v58, %v368_v43  ;;  %v3874_v58 = vld [vmem:[%s5034_s1 + $0x40] sm:$0xff] }
 0x119   : > { %v2738_v42 = vpack.c.bf16 %v799_v40, %v791_v36  ;;  %v801_v10 = vmax.f32 %v705_v33, 0.0  ;;  %v702_v6 = vadd.f32 %v3643_v48, %v534_v52  ;;  %v696_v46 = vadd.f32 %v3645_v34, %v528_v7  ;;  %2578 = vmatmul.mubr.msk.f32.gmra.mrb[14].mxu0 %vm914_vm0, %v3855_v37  ;;  %2594 = vmatmul.mubr.msk.f32.gmra.mrb[14].mxu1 %vm914_vm0, %v3855_v37  ;;  %v4083_v40 = vpop.permute.xlu1 %851 }
 0x11a   : > { %2761 = vmatpush1.bf16.msra.mxu1 %v2760_v32  ;;  %v790_v61 = vmax.f32 %v694_v45, 0.0  ;;  %v704_v5 = vadd.f32 %v3643_v48, %v536_v44  ;;  %1075 = vmatprep.mubr.f32.mxu0 %v3165_v31 }
 0x11b   : > { %2739 = vmatprep.subr.bf16.mxu0 %v2738_v42  ;;  %v2762_v53 = vpack.c.bf16 %v801_v10, %v793_v29  ;;  %v798_v34 = vmax.f32 %v702_v6, 0.0  ;;  %v792_v54 = vmax.f32 %v696_v46, 0.0  ;;  %1236 = vmatprep.mubr.f32.mxu1 %v3165_v31 }
 0x11c   : > { %v800_v56 = vmax.f32 %v704_v5, 0.0 }
 0x11d   : > { %2763 = vmatprep.subr.bf16.mxu1 %v2762_v53  ;;  %v2740_v57 = vpack.c.bf16 %v798_v34, %v790_v61  ;;  %2579 = vmatmul.mubr.msk.f32.gmra.mrb[16].mxu0 %vm914_vm0, %v3874_v58 }
 0x11e   : > { %v2764_v48 = vpack.c.bf16 %v800_v56, %v792_v54  ;;  %2595 = vmatmul.mubr.msk.f32.gmra.mrb[16].mxu1 %vm914_vm0, %v3874_v58  ;;  %1081 = vmatprep.mubr.f32.mxu0 %v3165_v31 }
 0x11f   : > { %2741 = vmatpush1.bf16.msra.mxu0 %v2740_v57  ;;  %1242 = vmatprep.mubr.f32.mxu1 %v3165_v31 }
 0x120   : > { %2765 = vmatpush1.bf16.msra.mxu1 %v2764_v48 }
 0x121   : > { %2580 = vmatmul.mubr.msk.f32.gmra.mrb[18].mxu0 %vm914_vm0, %v3885_v39 }
 0x122   : > { %2596 = vmatmul.mubr.msk.f32.gmra.mrb[18].mxu1 %vm914_vm0, %v3885_v39  ;;  %1087 = vmatprep.mubr.f32.mxu0 %v3165_v31 }
 0x123   : > { %1248 = vmatprep.mubr.f32.mxu1 %v3165_v31 }
 0x125   : > { %2581 = vmatmul.mubr.msk.f32.gmra.mrb[20].mxu0 %vm914_vm0, %v3896_v0 }
 0x126   : > { %2597 = vmatmul.mubr.msk.f32.gmra.mrb[20].mxu1 %vm914_vm0, %v3896_v0  ;;  %1093 = vmatprep.mubr.f32.mxu0 %v3165_v31 }
 0x127   : > { %1254 = vmatprep.mubr.f32.mxu1 %v3165_v31 }
 0x129   : > { %2582 = vmatmul.mubr.msk.f32.gmra.mrb[22].mxu0 %vm914_vm0, %v3907_v1 }
 0x12a   : > { %2598 = vmatmul.mubr.msk.f32.gmra.mrb[22].mxu1 %vm914_vm0, %v3907_v1  ;;  %1099 = vmatprep.mubr.f32.mxu0 %v3165_v31 }
 0x12b   : > { %1260 = vmatprep.mubr.f32.mxu1 %v3165_v31 }
 0x12d   : > { %2583 = vmatmul.mubr.msk.f32.gmra.mrb[24].mxu0 %vm914_vm0, %v3918_v2 }
 0x12e   : > { %2599 = vmatmul.mubr.msk.f32.gmra.mrb[24].mxu1 %vm914_vm0, %v3918_v2  ;;  %1105 = vmatprep.mubr.f32.mxu0 %v3165_v31 }
 0x12f   : > { %1266 = vmatprep.mubr.f32.mxu1 %v3165_v31 }
 0x131   : > { %2584 = vmatmul.mubr.msk.f32.gmra.mrb[26].mxu0 %vm914_vm0, %v3929_v27 }
 0x132   : > { %2600 = vmatmul.mubr.msk.f32.gmra.mrb[26].mxu1 %vm914_vm0, %v3929_v27  ;;  %1111 = vmatprep.mubr.f32.mxu0 %v3165_v31 }
 0x133   : > { %1272 = vmatprep.mubr.f32.mxu1 %v3165_v31 }
 0x135   : > { %2585 = vmatmul.mubr.msk.f32.gmra.mrb[28].mxu0 %vm914_vm0, %v3940_v26 }
 0x136   : > { %2601 = vmatmul.mubr.msk.f32.gmra.mrb[28].mxu1 %vm914_vm0, %v3940_v26  ;;  %1117 = vmatprep.mubr.f32.mxu0 %v3165_v31 }
 0x137   : > { %1278 = vmatprep.mubr.f32.mxu1 %v3165_v31 }
 0x139   : > { %2586 = vmatmul.mubr.msk.f32.gmra.mrb[30].mxu0 %vm914_vm0, %v3951_v3 }
 0x13a   : > { %2602 = vmatmul.mubr.msk.f32.gmra.mrb[30].mxu1 %vm914_vm0, %v3951_v3  ;;  %1349 = vmatprep.mubr.f32.mxu0 %v3165_v31 }
 0x13b   : > { %1510 = vmatprep.mubr.f32.mxu1 %v3165_v31 }
 0x13d   : > { %2603 = vmatmul.mubr.msk.f32.vlgmr.msra.gmra.mrb[32].mxu0 %vm914_vm0, %v3677_v4 }
 0x13e   : > { %2619 = vmatmul.mubr.msk.f32.vlgmr.msra.gmra.mrb[32].mxu1 %vm914_vm0, %v3677_v4  ;;  %1355 = vmatprep.mubr.f32.mxu0 %v3165_v31  ;;  %v4054_v4 = vpop.permute.xlu0 %836 }
 0x13f   : > { %1516 = vmatprep.mubr.f32.mxu1 %v3165_v31 }
 0x141   : > { %2604 = vmatmul.mubr.msk.f32.gmra.mrb[34].mxu0 %vm914_vm0, %v3701_v55 }
 0x142   : > { %2620 = vmatmul.mubr.msk.f32.gmra.mrb[34].mxu1 %vm914_vm0, %v3701_v55  ;;  %1361 = vmatprep.mubr.f32.mxu0 %v3165_v31  ;;  %v4073_v41 = vpop.permute.xlu0 %846 }
 0x143   : > { %1522 = vmatprep.mubr.f32.mxu1 %v3165_v31 }
 0x145   : > { %2605 = vmatmul.mubr.msk.f32.gmra.mrb[36].mxu0 %vm914_vm0, %v3726_v23 }
 0x146   : > { %2621 = vmatmul.mubr.msk.f32.gmra.mrb[36].mxu1 %vm914_vm0, %v3726_v23  ;;  %1367 = vmatprep.mubr.f32.mxu0 %v3165_v31  ;;  %v4093_v5 = vpop.permute.xlu0 %856 }
 0x147   : > { %1528 = vmatprep.mubr.f32.mxu1 %v3165_v31 }
 0x149   : > { %2606 = vmatmul.mubr.msk.f32.gmra.mrb[38].mxu0 %vm914_vm0, %v3752_v9 }
 0x14a   : > { %2622 = vmatmul.mubr.msk.f32.gmra.mrb[38].mxu1 %vm914_vm0, %v3752_v9  ;;  %1373 = vmatprep.mubr.f32.mxu0 %v3165_v31 }
 0x14b   : > { %1534 = vmatprep.mubr.f32.mxu1 %v3165_v31 }
 0x14d   : > { %2607 = vmatmul.mubr.msk.f32.gmra.mrb[40].mxu0 %vm914_vm0, %v3778_v19 }
 0x14e   : > { %2623 = vmatmul.mubr.msk.f32.gmra.mrb[40].mxu1 %vm914_vm0, %v3778_v19  ;;  %1379 = vmatprep.mubr.f32.mxu0 %v3165_v31 }
 0x14f   : > { %1540 = vmatprep.mubr.f32.mxu1 %v3165_v31 }
 0x151   : > { %2608 = vmatmul.mubr.msk.f32.gmra.mrb[42].mxu0 %vm914_vm0, %v3801_v30 }
 0x152   : > { %2624 = vmatmul.mubr.msk.f32.gmra.mrb[42].mxu1 %vm914_vm0, %v3801_v30  ;;  %1385 = vmatprep.mubr.f32.mxu0 %v3165_v31 }
 0x153   : > { %1546 = vmatprep.mubr.f32.mxu1 %v3165_v31 }
 0x155   : > { %2609 = vmatmul.mubr.msk.f32.gmra.mrb[44].mxu0 %vm914_vm0, %v3831_v60 }
 0x156   : > { %2625 = vmatmul.mubr.msk.f32.gmra.mrb[44].mxu1 %vm914_vm0, %v3831_v60  ;;  %1391 = vmatprep.mubr.f32.mxu0 %v3165_v31 }
 0x157   : > { %1552 = vmatprep.mubr.f32.mxu1 %v3165_v31 }
 0x159   : > { %2610 = vmatmul.mubr.msk.f32.gmra.mrb[46].mxu0 %vm914_vm0, %v3855_v37 }
 0x15a   : > { %2626 = vmatmul.mubr.msk.f32.gmra.mrb[46].mxu1 %vm914_vm0, %v3855_v37  ;;  %1397 = vmatprep.mubr.f32.mxu0 %v3165_v31 }
 0x15b   : > { %1558 = vmatprep.mubr.f32.mxu1 %v3165_v31 }
 0x15d   : > { %2611 = vmatmul.mubr.msk.f32.gmra.mrb[48].mxu0 %vm914_vm0, %v3874_v58 }
 0x15e   : > { %2627 = vmatmul.mubr.msk.f32.gmra.mrb[48].mxu1 %vm914_vm0, %v3874_v58  ;;  %1403 = vmatprep.mubr.f32.mxu0 %v3165_v31 }
 0x15f   : > { %1564 = vmatprep.mubr.f32.mxu1 %v3165_v31 }
 0x161   : > { %2612 = vmatmul.mubr.msk.f32.gmra.mrb[50].mxu0 %vm914_vm0, %v3885_v39 }
 0x162   : > { %2628 = vmatmul.mubr.msk.f32.gmra.mrb[50].mxu1 %vm914_vm0, %v3885_v39  ;;  %1409 = vmatprep.mubr.f32.mxu0 %v3165_v31 }
 0x163   : > { %1570 = vmatprep.mubr.f32.mxu1 %v3165_v31 }
 0x165   : > { %2613 = vmatmul.mubr.msk.f32.gmra.mrb[52].mxu0 %vm914_vm0, %v3896_v0 }
 0x166   : > { %2629 = vmatmul.mubr.msk.f32.gmra.mrb[52].mxu1 %vm914_vm0, %v3896_v0  ;;  %1415 = vmatprep.mubr.f32.mxu0 %v3165_v31 }
 0x167   : > { %1576 = vmatprep.mubr.f32.mxu1 %v3165_v31 }
 0x169   : > { %2614 = vmatmul.mubr.msk.f32.gmra.mrb[54].mxu0 %vm914_vm0, %v3907_v1 }
 0x16a   : > { %2630 = vmatmul.mubr.msk.f32.gmra.mrb[54].mxu1 %vm914_vm0, %v3907_v1  ;;  %1421 = vmatprep.mubr.f32.mxu0 %v3165_v31 }
 0x16b   : > { %1582 = vmatprep.mubr.f32.mxu1 %v3165_v31 }
 0x16d   : > { %2615 = vmatmul.mubr.msk.f32.gmra.mrb[56].mxu0 %vm914_vm0, %v3918_v2 }
 0x16e   : > { %2631 = vmatmul.mubr.msk.f32.gmra.mrb[56].mxu1 %vm914_vm0, %v3918_v2  ;;  %1427 = vmatprep.mubr.f32.mxu0 %v3165_v31 }
 0x16f   : > { %1588 = vmatprep.mubr.f32.mxu1 %v3165_v31 }
 0x171   : > { %2616 = vmatmul.mubr.msk.f32.gmra.mrb[58].mxu0 %vm914_vm0, %v3929_v27 }
 0x172   : > { %2632 = vmatmul.mubr.msk.f32.gmra.mrb[58].mxu1 %vm914_vm0, %v3929_v27  ;;  %1433 = vmatprep.mubr.f32.mxu0 %v3165_v31 }
 0x173   : > { %1594 = vmatprep.mubr.f32.mxu1 %v3165_v31 }
 0x175   : > { %2617 = vmatmul.mubr.msk.f32.gmra.mrb[60].mxu0 %vm914_vm0, %v3940_v26 }
 0x176   : > { %2633 = vmatmul.mubr.msk.f32.gmra.mrb[60].mxu1 %vm914_vm0, %v3940_v26  ;;  %1439 = vmatprep.mubr.f32.mxu0 %v3165_v31  ;;  %v4103_v26 = vpop.permute.xlu1 %861 }
 0x177   : > { %1600 = vmatprep.mubr.f32.mxu1 %v3165_v31 }
 0x179   : > { %2618 = vmatmul.mubr.msk.f32.gmra.mrb[62].mxu0 %vm914_vm0, %v3951_v3 }
 0x17a   : > { %2634 = vmatmul.mubr.msk.f32.gmra.mrb[62].mxu1 %vm914_vm0, %v3951_v3 }
 0x1cf   : > { %v1029_v55 = vpop.f32.mrb[0].mxu0  ;;  %v1190_v23 = vpop.f32.mrb[0].mxu1 }
 0x1d0   : > { %v1030_v9 = vadd.f32 %v1029_v55, %v4054_v4  ;;  %v1191_v19 = vadd.f32 %v1190_v23, %v4054_v4  ;;  %v1031_v30 = vpop.f32.mrb[1].mxu0  ;;  %v1192_v38 = vpop.f32.mrb[1].mxu1 }
 0x1d1   : > { %v1032_v8 = vadd.f32 %v1031_v30, %v4054_v4  ;;  %v1193_v31 = vadd.f32 %v1192_v38, %v4054_v4 }
 0x1d2   : > { %v1607_v11 = vmax.f32 %v1030_v9, 0.0  ;;  %v1609_v14 = vmax.f32 %v1191_v19, 0.0 }
 0x1d3   : > { %v1608_v16 = vmax.f32 %v1032_v8, 0.0  ;;  %v1610_v17 = vmax.f32 %v1193_v31, 0.0  ;;  %v1035_v60 = vpop.f32.mrb[2].mxu0 }
 0x1d4   : > { %1735 = vst [vmem:[%s4063_s6] sm:$0xff] %v1607_v11  ;;  %1737 = vst [vmem:[%s4063_s6 + $0x10] sm:$0xff] %v1609_v14  ;;  %v1036_v18 = vadd.f32 %v1035_v60, %v4061_v15  ;;  %v1196_v50 = vpop.f32.mrb[2].mxu1  ;;  %v1037_v49 = vpop.f32.mrb[3].mxu0 }
 0x1d5   : > { %1736 = vst [vmem:[%s4063_s6 + $0x8] sm:$0xff] %v1608_v16  ;;  %1738 = vst [vmem:[%s4063_s6 + $0x18] sm:$0xff] %v1610_v17  ;;  %v1197_v20 = vadd.f32 %v1196_v50, %v4061_v15  ;;  %v1038_v59 = vadd.f32 %v1037_v49, %v4061_v15  ;;  %v1198_v21 = vpop.f32.mrb[3].mxu1  ;;  %v4113_v17 = vpop.permute.xlu0 %866 }
 0x1d6   : > { %v1615_v22 = vmax.f32 %v1036_v18, 0.0  ;;  %v1199_v24 = vadd.f32 %v1198_v21, %v4061_v15 }
 0x1d7   : > { %v1617_v63 = vmax.f32 %v1197_v20, 0.0  ;;  %v1616_v12 = vmax.f32 %v1038_v59, 0.0  ;;  %v1041_v25 = vpop.f32.mrb[4].mxu0 }
 0x1d8   : > { %1743 = vst [vmem:[%s4063_s6 + $0x40] sm:$0xff] %v1615_v22  ;;  %v1618_v47 = vmax.f32 %v1199_v24, 0.0  ;;  %v1042_v51 = vadd.f32 %v1041_v25, %v4073_v41  ;;  %v1202_v35 = vpop.f32.mrb[4].mxu1  ;;  %v1043_v43 = vpop.f32.mrb[5].mxu0 }
 0x1d9   : > { %1745 = vst [vmem:[%s4063_s6 + $0x50] sm:$0xff] %v1617_v63  ;;  %1744 = vst [vmem:[%s4063_s6 + $0x48] sm:$0xff] %v1616_v12  ;;  %v1203_v28 = vadd.f32 %v1202_v35, %v4073_v41  ;;  %v1044_v36 = vadd.f32 %v1043_v43, %v4073_v41  ;;  %v1204_v13 = vpop.f32.mrb[5].mxu1  ;;  %v4123_v25 = vpop.permute.xlu1 %871 }
 0x1da   : > { %1746 = vst [vmem:[%s4063_s6 + $0x58] sm:$0xff] %v1618_v47  ;;  %v1623_v62 = vmax.f32 %v1042_v51, 0.0  ;;  %v1205_v37 = vadd.f32 %v1204_v13, %v4073_v41 }
 0x1db   : > { %v1625_v33 = vmax.f32 %v1203_v28, 0.0  ;;  %v1624_v52 = vmax.f32 %v1044_v36, 0.0  ;;  %v1047_v7 = vpop.f32.mrb[6].mxu0 }
 0x1dc   : > { %1751 = vst [vmem:[%s4063_s6 + $0x80] sm:$0xff] %v1623_v62  ;;  %v1626_v32 = vmax.f32 %v1205_v37, 0.0  ;;  %v1048_v29 = vadd.f32 %v1047_v7, %v4083_v40  ;;  %v1208_v45 = vpop.f32.mrb[6].mxu1  ;;  %v1049_v44 = vpop.f32.mrb[7].mxu0 }
 0x1dd   : > { %1753 = vst [vmem:[%s4063_s6 + $0x90] sm:$0xff] %v1625_v33  ;;  %1752 = vst [vmem:[%s4063_s6 + $0x88] sm:$0xff] %v1624_v52  ;;  %v1209_v42 = vadd.f32 %v1208_v45, %v4083_v40  ;;  %v1050_v10 = vadd.f32 %v1049_v44, %v4083_v40  ;;  %v1210_v6 = vpop.f32.mrb[7].mxu1  ;;  %v4133_v45 = vpop.permute.xlu0 %876 }
 0x1de   : > { %1754 = vst [vmem:[%s4063_s6 + $0x98] sm:$0xff] %v1626_v32  ;;  %v1631_v46 = vmax.f32 %v1048_v29, 0.0  ;;  %v1211_v61 = vadd.f32 %v1210_v6, %v4083_v40 }
 0x1df   : > { %v1633_v58 = vmax.f32 %v1209_v42, 0.0  ;;  %v1632_v53 = vmax.f32 %v1050_v10, 0.0  ;;  %v1053_v34 = vpop.f32.mrb[8].mxu0 }
 0x1e0   : > { %1759 = vst [vmem:[%s4063_s6 + $0xc0] sm:$0xff] %v1631_v46  ;;  %v1634_v54 = vmax.f32 %v1211_v61, 0.0  ;;  %v1054_v56 = vadd.f32 %v1053_v34, %v4093_v5  ;;  %v1214_v57 = vpop.f32.mrb[8].mxu1  ;;  %v1055_v48 = vpop.f32.mrb[9].mxu0 }
 0x1e1   : > { %1761 = vst [vmem:[%s4063_s6 + $0xd0] sm:$0xff] %v1633_v58  ;;  %1760 = vst [vmem:[%s4063_s6 + $0xc8] sm:$0xff] %v1632_v53  ;;  %v1215_v39 = vadd.f32 %v1214_v57, %v4093_v5  ;;  %v1056_v0 = vadd.f32 %v1055_v48, %v4093_v5  ;;  %v1216_v1 = vpop.f32.mrb[9].mxu1  ;;  %v4143_v57 = vpop.permute.xlu1 %881 }
 0x1e2   : > { %1762 = vst [vmem:[%s4063_s6 + $0xd8] sm:$0xff] %v1634_v54  ;;  %v1639_v2 = vmax.f32 %v1054_v56, 0.0  ;;  %v1217_v27 = vadd.f32 %v1216_v1, %v4093_v5 }
 0x1e3   : > { %v1641_v3 = vmax.f32 %v1215_v39, 0.0  ;;  %v1640_v55 = vmax.f32 %v1056_v0, 0.0  ;;  %v1059_v23 = vpop.f32.mrb[10].mxu0 }
 0x1e4   : > { %1767 = vst [vmem:[%s4063_s6 + $0x100] sm:$0xff] %v1639_v2  ;;  %v1642_v9 = vmax.f32 %v1217_v27, 0.0  ;;  %v1060_v19 = vadd.f32 %v1059_v23, %v4103_v26  ;;  %v1220_v30 = vpop.f32.mrb[10].mxu1  ;;  %v1061_v38 = vpop.f32.mrb[11].mxu0 }
 0x1e5   : > { %1769 = vst [vmem:[%s4063_s6 + $0x110] sm:$0xff] %v1641_v3  ;;  %1768 = vst [vmem:[%s4063_s6 + $0x108] sm:$0xff] %v1640_v55  ;;  %v1221_v8 = vadd.f32 %v1220_v30, %v4103_v26  ;;  %v1062_v31 = vadd.f32 %v1061_v38, %v4103_v26  ;;  %v1222_v11 = vpop.f32.mrb[11].mxu1  ;;  %v4153_v38 = vpop.permute.xlu0 %886 }
 0x1e6   : > { %1770 = vst [vmem:[%s4063_s6 + $0x118] sm:$0xff] %v1642_v9  ;;  %v1647_v14 = vmax.f32 %v1060_v19, 0.0  ;;  %v1223_v16 = vadd.f32 %v1222_v11, %v4103_v26 }
 0x1e7   : > { %v1649_v60 = vmax.f32 %v1221_v8, 0.0  ;;  %v1648_v18 = vmax.f32 %v1062_v31, 0.0 }
 0x1e8   : > { %1775 = vst [vmem:[%s4063_s6 + $0x140] sm:$0xff] %v1647_v14  ;;  %v1650_v50 = vmax.f32 %v1223_v16, 0.0  ;;  %v1065_v49 = vpop.f32.mrb[12].mxu0  ;;  %v1226_v20 = vpop.f32.mrb[12].mxu1 }
 0x1e9   : > { %1777 = vst [vmem:[%s4063_s6 + $0x150] sm:$0xff] %v1649_v60  ;;  %1776 = vst [vmem:[%s4063_s6 + $0x148] sm:$0xff] %v1648_v18  ;;  %v1066_v59 = vadd.f32 %v1065_v49, %v4113_v17  ;;  %v1227_v21 = vadd.f32 %v1226_v20, %v4113_v17  ;;  %v1067_v22 = vpop.f32.mrb[13].mxu0  ;;  %v1228_v24 = vpop.f32.mrb[13].mxu1 }
 0x1ea   : > { %1778 = vst [vmem:[%s4063_s6 + $0x158] sm:$0xff] %v1650_v50  ;;  %v1068_v63 = vadd.f32 %v1067_v22, %v4113_v17  ;;  %v1229_v12 = vadd.f32 %v1228_v24, %v4113_v17  ;;  %v4163_v22 = vpop.permute.xlu1 %891 }
 0x1eb   : > { %v1655_v47 = vmax.f32 %v1066_v59, 0.0  ;;  %v1657_v51 = vmax.f32 %v1227_v21, 0.0 }
 0x1ec   : > { %v1656_v35 = vmax.f32 %v1068_v63, 0.0  ;;  %v1658_v43 = vmax.f32 %v1229_v12, 0.0  ;;  %v1071_v28 = vpop.f32.mrb[14].mxu0  ;;  %v1232_v36 = vpop.f32.mrb[14].mxu1 }
 0x1ed   : > { %1783 = vst [vmem:[%s4063_s6 + $0x180] sm:$0xff] %v1655_v47  ;;  %1785 = vst [vmem:[%s4063_s6 + $0x190] sm:$0xff] %v1657_v51  ;;  %v1072_v13 = vadd.f32 %v1071_v28, %v4123_v25  ;;  %v1233_v62 = vadd.f32 %v1232_v36, %v4123_v25  ;;  %v1073_v37 = vpop.f32.mrb[15].mxu0  ;;  %v1234_v33 = vpop.f32.mrb[15].mxu1 }
 0x1ee   : > { %1784 = vst [vmem:[%s4063_s6 + $0x188] sm:$0xff] %v1656_v35  ;;  %1786 = vst [vmem:[%s4063_s6 + $0x198] sm:$0xff] %v1658_v43  ;;  %v1074_v52 = vadd.f32 %v1073_v37, %v4123_v25  ;;  %v1235_v7 = vadd.f32 %v1234_v33, %v4123_v25  ;;  %v4173_v33 = vpop.permute.xlu0 %896 }
 0x1ef   : > { %v1663_v32 = vmax.f32 %v1072_v13, 0.0  ;;  %v1665_v29 = vmax.f32 %v1233_v62, 0.0 }
 0x1f0   : > { %v1664_v44 = vmax.f32 %v1074_v52, 0.0  ;;  %v1666_v42 = vmax.f32 %v1235_v7, 0.0  ;;  %v1077_v10 = vpop.f32.mrb[16].mxu0 }
 0x1f1   : > { %1791 = vst [vmem:[%s4063_s6 + $0x1c0] sm:$0xff] %v1663_v32  ;;  %1793 = vst [vmem:[%s4063_s6 + $0x1d0] sm:$0xff] %v1665_v29  ;;  %v1078_v6 = vadd.f32 %v1077_v10, %v4133_v45  ;;  %v1238_v46 = vpop.f32.mrb[16].mxu1  ;;  %v1079_v61 = vpop.f32.mrb[17].mxu0 }
 0x1f2   : > { %1792 = vst [vmem:[%s4063_s6 + $0x1c8] sm:$0xff] %v1664_v44  ;;  %1794 = vst [vmem:[%s4063_s6 + $0x1d8] sm:$0xff] %v1666_v42  ;;  %v1239_v58 = vadd.f32 %v1238_v46, %v4133_v45  ;;  %v1080_v53 = vadd.f32 %v1079_v61, %v4133_v45  ;;  %v1240_v34 = vpop.f32.mrb[17].mxu1 }
 0x1f3   : > { %v1671_v54 = vmax.f32 %v1078_v6, 0.0  ;;  %v1241_v56 = vadd.f32 %v1240_v34, %v4133_v45  ;;  %v4183_v34 = vpop.permute.xlu1 %901 }
 0x1f4   : > { %v1673_v48 = vmax.f32 %v1239_v58, 0.0  ;;  %v1672_v39 = vmax.f32 %v1080_v53, 0.0  ;;  %v1083_v0 = vpop.f32.mrb[18].mxu0 }
 0x1f5   : > { %1799 = vst [vmem:[%s4063_s6 + $0x200] sm:$0xff] %v1671_v54  ;;  %v1674_v1 = vmax.f32 %v1241_v56, 0.0  ;;  %v1084_v2 = vadd.f32 %v1083_v0, %v4143_v57  ;;  %v1244_v27 = vpop.f32.mrb[18].mxu1  ;;  %v1085_v3 = vpop.f32.mrb[19].mxu0 }
 0x1f6   : > { %1801 = vst [vmem:[%s4063_s6 + $0x210] sm:$0xff] %v1673_v48  ;;  %1800 = vst [vmem:[%s4063_s6 + $0x208] sm:$0xff] %v1672_v39  ;;  %v1245_v55 = vadd.f32 %v1244_v27, %v4143_v57  ;;  %v1086_v23 = vadd.f32 %v1085_v3, %v4143_v57  ;;  %v1246_v9 = vpop.f32.mrb[19].mxu1 }
 0x1f7   : > { %1802 = vst [vmem:[%s4063_s6 + $0x218] sm:$0xff] %v1674_v1  ;;  %v1679_v19 = vmax.f32 %v1084_v2, 0.0  ;;  %v1247_v30 = vadd.f32 %v1246_v9, %v4143_v57 }
 0x1f8   : > { %v1681_v8 = vmax.f32 %v1245_v55, 0.0  ;;  %v1680_v31 = vmax.f32 %v1086_v23, 0.0  ;;  %v1089_v11 = vpop.f32.mrb[20].mxu0 }
 0x1f9   : > { %1807 = vst [vmem:[%s4063_s6 + $0x240] sm:$0xff] %v1679_v19  ;;  %v1682_v14 = vmax.f32 %v1247_v30, 0.0  ;;  %v1090_v16 = vadd.f32 %v1089_v11, %v4153_v38  ;;  %v1250_v60 = vpop.f32.mrb[20].mxu1  ;;  %v1091_v18 = vpop.f32.mrb[21].mxu0 }
 0x1fa   : > { %1809 = vst [vmem:[%s4063_s6 + $0x250] sm:$0xff] %v1681_v8  ;;  %1808 = vst [vmem:[%s4063_s6 + $0x248] sm:$0xff] %v1680_v31  ;;  %v1251_v50 = vadd.f32 %v1250_v60, %v4153_v38  ;;  %v1092_v49 = vadd.f32 %v1091_v18, %v4153_v38  ;;  %v1252_v20 = vpop.f32.mrb[21].mxu1  ;;  %v4193_v19 = vpop.permute.xlu0 %906 }
 0x1fb   : > { %1810 = vst [vmem:[%s4063_s6 + $0x258] sm:$0xff] %v1682_v14  ;;  %v1687_v59 = vmax.f32 %v1090_v16, 0.0  ;;  %v1253_v21 = vadd.f32 %v1252_v20, %v4153_v38 }
 0x1fc   : > { %v1689_v24 = vmax.f32 %v1251_v50, 0.0  ;;  %v1688_v63 = vmax.f32 %v1092_v49, 0.0  ;;  %v1095_v12 = vpop.f32.mrb[22].mxu0 }
 0x1fd   : > { %1815 = vst [vmem:[%s4063_s6 + $0x280] sm:$0xff] %v1687_v59  ;;  %v1690_v47 = vmax.f32 %v1253_v21, 0.0  ;;  %v1096_v51 = vadd.f32 %v1095_v12, %v4163_v22  ;;  %v1256_v35 = vpop.f32.mrb[22].mxu1  ;;  %v1097_v43 = vpop.f32.mrb[23].mxu0 }
 0x1fe   : > { %1817 = vst [vmem:[%s4063_s6 + $0x290] sm:$0xff] %v1689_v24  ;;  %1816 = vst [vmem:[%s4063_s6 + $0x288] sm:$0xff] %v1688_v63  ;;  %v1257_v28 = vadd.f32 %v1256_v35, %v4163_v22  ;;  %v1098_v36 = vadd.f32 %v1097_v43, %v4163_v22  ;;  %v1258_v13 = vpop.f32.mrb[23].mxu1  ;;  %v4203_v21 = vpop.permute.xlu1 %911 }
 0x1ff   : > { %1818 = vst [vmem:[%s4063_s6 + $0x298] sm:$0xff] %v1690_v47  ;;  %v1695_v62 = vmax.f32 %v1096_v51, 0.0  ;;  %v1259_v37 = vadd.f32 %v1258_v13, %v4163_v22 }
 0x200   : > { %v1697_v52 = vmax.f32 %v1257_v28, 0.0  ;;  %v1696_v7 = vmax.f32 %v1098_v36, 0.0  ;;  %v1101_v32 = vpop.f32.mrb[24].mxu0 }
 0x201   : > { %1823 = vst [vmem:[%s4063_s6 + $0x2c0] sm:$0xff] %v1695_v62  ;;  %v1698_v29 = vmax.f32 %v1259_v37, 0.0  ;;  %v1102_v44 = vadd.f32 %v1101_v32, %v4173_v33  ;;  %v1262_v42 = vpop.f32.mrb[24].mxu1  ;;  %v1103_v10 = vpop.f32.mrb[25].mxu0 }
 0x202   : > { %1825 = vst [vmem:[%s4063_s6 + $0x2d0] sm:$0xff] %v1697_v52  ;;  %1824 = vst [vmem:[%s4063_s6 + $0x2c8] sm:$0xff] %v1696_v7  ;;  %v1263_v6 = vadd.f32 %v1262_v42, %v4173_v33  ;;  %v1104_v46 = vadd.f32 %v1103_v10, %v4173_v33  ;;  %v1264_v61 = vpop.f32.mrb[25].mxu1 }
 0x203   : > { %1826 = vst [vmem:[%s4063_s6 + $0x2d8] sm:$0xff] %v1698_v29  ;;  %v1703_v58 = vmax.f32 %v1102_v44, 0.0  ;;  %v1265_v53 = vadd.f32 %v1264_v61, %v4173_v33 }
 0x204   : > { %v1705_v54 = vmax.f32 %v1263_v6, 0.0  ;;  %v1704_v56 = vmax.f32 %v1104_v46, 0.0  ;;  %v1107_v48 = vpop.f32.mrb[26].mxu0 }
 0x205   : > { %1831 = vst [vmem:[%s4063_s6 + $0x300] sm:$0xff] %v1703_v58  ;;  %v1706_v39 = vmax.f32 %v1265_v53, 0.0  ;;  %v1108_v0 = vadd.f32 %v1107_v48, %v4183_v34  ;;  %v1268_v1 = vpop.f32.mrb[26].mxu1  ;;  %v1109_v2 = vpop.f32.mrb[27].mxu0 }
 0x206   : > { %1833 = vst [vmem:[%s4063_s6 + $0x310] sm:$0xff] %v1705_v54  ;;  %1832 = vst [vmem:[%s4063_s6 + $0x308] sm:$0xff] %v1704_v56  ;;  %v1269_v27 = vadd.f32 %v1268_v1, %v4183_v34  ;;  %v1110_v3 = vadd.f32 %v1109_v2, %v4183_v34  ;;  %v1270_v55 = vpop.f32.mrb[27].mxu1 }
 0x207   : > { %1834 = vst [vmem:[%s4063_s6 + $0x318] sm:$0xff] %v1706_v39  ;;  %v1711_v23 = vmax.f32 %v1108_v0, 0.0  ;;  %v1271_v9 = vadd.f32 %v1270_v55, %v4183_v34 }
 0x208   : > { %v1713_v30 = vmax.f32 %v1269_v27, 0.0  ;;  %v1712_v8 = vmax.f32 %v1110_v3, 0.0  ;;  %v1113_v31 = vpop.f32.mrb[28].mxu0 }
 0x209   : > { %1839 = vst [vmem:[%s4063_s6 + $0x340] sm:$0xff] %v1711_v23  ;;  %v1714_v11 = vmax.f32 %v1271_v9, 0.0  ;;  %v1114_v14 = vadd.f32 %v1113_v31, %v4193_v19  ;;  %v1274_v16 = vpop.f32.mrb[28].mxu1  ;;  %v1115_v60 = vpop.f32.mrb[29].mxu0 }
 0x20a   : > { %1841 = vst [vmem:[%s4063_s6 + $0x350] sm:$0xff] %v1713_v30  ;;  %1840 = vst [vmem:[%s4063_s6 + $0x348] sm:$0xff] %v1712_v8  ;;  %v1275_v18 = vadd.f32 %v1274_v16, %v4193_v19  ;;  %v1116_v50 = vadd.f32 %v1115_v60, %v4193_v19  ;;  %v1276_v49 = vpop.f32.mrb[29].mxu1 }
 0x20b   : > { %1842 = vst [vmem:[%s4063_s6 + $0x358] sm:$0xff] %v1714_v11  ;;  %v1719_v20 = vmax.f32 %v1114_v14, 0.0  ;;  %v1277_v59 = vadd.f32 %v1276_v49, %v4193_v19 }
 0x20c   : > { %v1721_v24 = vmax.f32 %v1275_v18, 0.0  ;;  %v1720_v63 = vmax.f32 %v1116_v50, 0.0  ;;  %v1119_v12 = vpop.f32.mrb[30].mxu0 }
 0x20d   : > { %1847 = vst [vmem:[%s4063_s6 + $0x380] sm:$0xff] %v1719_v20  ;;  %v1722_v47 = vmax.f32 %v1277_v59, 0.0  ;;  %v1120_v51 = vadd.f32 %v1119_v12, %v4203_v21  ;;  %v1280_v35 = vpop.f32.mrb[30].mxu1  ;;  %v1121_v43 = vpop.f32.mrb[31].mxu0 }
 0x20e   : > { %1849 = vst [vmem:[%s4063_s6 + $0x390] sm:$0xff] %v1721_v24  ;;  %1848 = vst [vmem:[%s4063_s6 + $0x388] sm:$0xff] %v1720_v63  ;;  %v1281_v28 = vadd.f32 %v1280_v35, %v4203_v21  ;;  %v1122_v36 = vadd.f32 %v1121_v43, %v4203_v21  ;;  %v1282_v13 = vpop.f32.mrb[31].mxu1 }
 0x20f   : > { %1850 = vst [vmem:[%s4063_s6 + $0x398] sm:$0xff] %v1722_v47  ;;  %v1727_v62 = vmax.f32 %v1120_v51, 0.0  ;;  %v1283_v37 = vadd.f32 %v1282_v13, %v4203_v21 }
 0x210   : > { %v1729_v52 = vmax.f32 %v1281_v28, 0.0  ;;  %v1728_v7 = vmax.f32 %v1122_v36, 0.0  ;;  %v1351_v32 = vpop.f32.mrb[32].mxu0 }
 0x211   : > { %1855 = vst [vmem:[%s4063_s6 + $0x3c0] sm:$0xff] %v1727_v62  ;;  %v1730_v29 = vmax.f32 %v1283_v37, 0.0  ;;  %v1352_v44 = vadd.f32 %v1351_v32, %v4054_v4  ;;  %v1512_v42 = vpop.f32.mrb[32].mxu1  ;;  %v1353_v10 = vpop.f32.mrb[33].mxu0 }
 0x212   : > { %1857 = vst [vmem:[%s4063_s6 + $0x3d0] sm:$0xff] %v1729_v52  ;;  %1856 = vst [vmem:[%s4063_s6 + $0x3c8] sm:$0xff] %v1728_v7  ;;  %v1513_v6 = vadd.f32 %v1512_v42, %v4054_v4  ;;  %v1354_v46 = vadd.f32 %v1353_v10, %v4054_v4  ;;  %v1514_v61 = vpop.f32.mrb[33].mxu1 }
 0x213   : > { %1858 = vst [vmem:[%s4063_s6 + $0x3d8] sm:$0xff] %v1730_v29  ;;  %v1611_v58 = vmax.f32 %v1352_v44, 0.0  ;;  %v1515_v53 = vadd.f32 %v1514_v61, %v4054_v4 }
 0x214   : > { %v1613_v54 = vmax.f32 %v1513_v6, 0.0  ;;  %v1612_v56 = vmax.f32 %v1354_v46, 0.0  ;;  %v1357_v48 = vpop.f32.mrb[34].mxu0 }
 0x215   : > { %1739 = vst [vmem:[%s4063_s6 + $0x20] sm:$0xff] %v1611_v58  ;;  %v1614_v39 = vmax.f32 %v1515_v53, 0.0  ;;  %v1358_v0 = vadd.f32 %v1357_v48, %v4061_v15  ;;  %v1518_v1 = vpop.f32.mrb[34].mxu1  ;;  %v1359_v2 = vpop.f32.mrb[35].mxu0 }
 0x216   : > { %1741 = vst [vmem:[%s4063_s6 + $0x30] sm:$0xff] %v1613_v54  ;;  %1740 = vst [vmem:[%s4063_s6 + $0x28] sm:$0xff] %v1612_v56  ;;  %v1519_v27 = vadd.f32 %v1518_v1, %v4061_v15  ;;  %v1360_v3 = vadd.f32 %v1359_v2, %v4061_v15  ;;  %v1520_v55 = vpop.f32.mrb[35].mxu1 }
 0x217   : > { %1742 = vst [vmem:[%s4063_s6 + $0x38] sm:$0xff] %v1614_v39  ;;  %v1619_v4 = vmax.f32 %v1358_v0, 0.0  ;;  %v1521_v23 = vadd.f32 %v1520_v55, %v4061_v15 }
 0x218   : > { %v1621_v9 = vmax.f32 %v1519_v27, 0.0  ;;  %v1620_v30 = vmax.f32 %v1360_v3, 0.0  ;;  %v1363_v8 = vpop.f32.mrb[36].mxu0 }
 0x219   : > { %1747 = vst [vmem:[%s4063_s6 + $0x60] sm:$0xff] %v1619_v4  ;;  %v1622_v31 = vmax.f32 %v1521_v23, 0.0  ;;  %v1364_v11 = vadd.f32 %v1363_v8, %v4073_v41  ;;  %v1524_v14 = vpop.f32.mrb[36].mxu1  ;;  %v1365_v16 = vpop.f32.mrb[37].mxu0 }
 0x21a   : > { %1749 = vst [vmem:[%s4063_s6 + $0x70] sm:$0xff] %v1621_v9  ;;  %1748 = vst [vmem:[%s4063_s6 + $0x68] sm:$0xff] %v1620_v30  ;;  %v1525_v60 = vadd.f32 %v1524_v14, %v4073_v41  ;;  %v1366_v18 = vadd.f32 %v1365_v16, %v4073_v41  ;;  %v1526_v50 = vpop.f32.mrb[37].mxu1 }
 0x21b   : > { %1750 = vst [vmem:[%s4063_s6 + $0x78] sm:$0xff] %v1622_v31  ;;  %v1627_v15 = vmax.f32 %v1364_v11, 0.0  ;;  %v1527_v49 = vadd.f32 %v1526_v50, %v4073_v41 }
 0x21c   : > { %v1629_v20 = vmax.f32 %v1525_v60, 0.0  ;;  %v1628_v59 = vmax.f32 %v1366_v18, 0.0  ;;  %v1369_v24 = vpop.f32.mrb[38].mxu0 }
 0x21d   : > { %1755 = vst [vmem:[%s4063_s6 + $0xa0] sm:$0xff] %v1627_v15  ;;  %v1630_v63 = vmax.f32 %v1527_v49, 0.0  ;;  %v1370_v12 = vadd.f32 %v1369_v24, %v4083_v40  ;;  %v1530_v47 = vpop.f32.mrb[38].mxu1  ;;  %v1371_v51 = vpop.f32.mrb[39].mxu0 }
 0x21e   : > { %1757 = vst [vmem:[%s4063_s6 + $0xb0] sm:$0xff] %v1629_v20  ;;  %1756 = vst [vmem:[%s4063_s6 + $0xa8] sm:$0xff] %v1628_v59  ;;  %v1531_v35 = vadd.f32 %v1530_v47, %v4083_v40  ;;  %v1372_v43 = vadd.f32 %v1371_v51, %v4083_v40  ;;  %v1532_v28 = vpop.f32.mrb[39].mxu1 }
 0x21f   : > { %1758 = vst [vmem:[%s4063_s6 + $0xb8] sm:$0xff] %v1630_v63  ;;  %v1635_v41 = vmax.f32 %v1370_v12, 0.0  ;;  %v1533_v36 = vadd.f32 %v1532_v28, %v4083_v40 }
 0x220   : > { %v1637_v13 = vmax.f32 %v1531_v35, 0.0  ;;  %v1636_v62 = vmax.f32 %v1372_v43, 0.0  ;;  %v1375_v37 = vpop.f32.mrb[40].mxu0 }
 0x221   : > { %1763 = vst [vmem:[%s4063_s6 + $0xe0] sm:$0xff] %v1635_v41  ;;  %v1638_v52 = vmax.f32 %v1533_v36, 0.0  ;;  %v1376_v7 = vadd.f32 %v1375_v37, %v4093_v5  ;;  %v1536_v32 = vpop.f32.mrb[40].mxu1  ;;  %v1377_v29 = vpop.f32.mrb[41].mxu0 }
 0x222   : > { %1765 = vst [vmem:[%s4063_s6 + $0xf0] sm:$0xff] %v1637_v13  ;;  %1764 = vst [vmem:[%s4063_s6 + $0xe8] sm:$0xff] %v1636_v62  ;;  %v1537_v44 = vadd.f32 %v1536_v32, %v4093_v5  ;;  %v1378_v42 = vadd.f32 %v1377_v29, %v4093_v5  ;;  %v1538_v10 = vpop.f32.mrb[41].mxu1 }
 0x223   : > { %1766 = vst [vmem:[%s4063_s6 + $0xf8] sm:$0xff] %v1638_v52  ;;  %v1643_v40 = vmax.f32 %v1376_v7, 0.0  ;;  %v1539_v6 = vadd.f32 %v1538_v10, %v4093_v5 }
 0x224   : > { %v1645_v46 = vmax.f32 %v1537_v44, 0.0  ;;  %v1644_v61 = vmax.f32 %v1378_v42, 0.0  ;;  %v1381_v58 = vpop.f32.mrb[42].mxu0 }
 0x225   : > { %1771 = vst [vmem:[%s4063_s6 + $0x120] sm:$0xff] %v1643_v40  ;;  %v1646_v53 = vmax.f32 %v1539_v6, 0.0  ;;  %v1382_v54 = vadd.f32 %v1381_v58, %v4103_v26  ;;  %v1542_v56 = vpop.f32.mrb[42].mxu1  ;;  %v1383_v48 = vpop.f32.mrb[43].mxu0 }
 0x226   : > { %1773 = vst [vmem:[%s4063_s6 + $0x130] sm:$0xff] %v1645_v46  ;;  %1772 = vst [vmem:[%s4063_s6 + $0x128] sm:$0xff] %v1644_v61  ;;  %v1543_v39 = vadd.f32 %v1542_v56, %v4103_v26  ;;  %v1384_v0 = vadd.f32 %v1383_v48, %v4103_v26  ;;  %v1544_v1 = vpop.f32.mrb[43].mxu1 }
 0x227   : > { %1774 = vst [vmem:[%s4063_s6 + $0x138] sm:$0xff] %v1646_v53  ;;  %v1651_v5 = vmax.f32 %v1382_v54, 0.0  ;;  %v1545_v2 = vadd.f32 %v1544_v1, %v4103_v26 }
 0x228   : > { %v1653_v27 = vmax.f32 %v1543_v39, 0.0  ;;  %v1652_v3 = vmax.f32 %v1384_v0, 0.0  ;;  %v1387_v55 = vpop.f32.mrb[44].mxu0 }
 0x229   : > { %1779 = vst [vmem:[%s4063_s6 + $0x160] sm:$0xff] %v1651_v5  ;;  %v1654_v4 = vmax.f32 %v1545_v2, 0.0  ;;  %v1388_v23 = vadd.f32 %v1387_v55, %v4113_v17  ;;  %v1548_v9 = vpop.f32.mrb[44].mxu1  ;;  %v1389_v30 = vpop.f32.mrb[45].mxu0 }
 0x22a   : > { %1781 = vst [vmem:[%s4063_s6 + $0x170] sm:$0xff] %v1653_v27  ;;  %1780 = vst [vmem:[%s4063_s6 + $0x168] sm:$0xff] %v1652_v3  ;;  %v1549_v8 = vadd.f32 %v1548_v9, %v4113_v17  ;;  %v1390_v31 = vadd.f32 %v1389_v30, %v4113_v17  ;;  %v1550_v11 = vpop.f32.mrb[45].mxu1 }
 0x22b   : > { %1782 = vst [vmem:[%s4063_s6 + $0x178] sm:$0xff] %v1654_v4  ;;  %v1659_v26 = vmax.f32 %v1388_v23, 0.0  ;;  %v1551_v14 = vadd.f32 %v1550_v11, %v4113_v17 }
 0x22c   : > { %v1661_v16 = vmax.f32 %v1549_v8, 0.0  ;;  %v1660_v60 = vmax.f32 %v1390_v31, 0.0  ;;  %v1393_v18 = vpop.f32.mrb[46].mxu0 }
 0x22d   : > { %1787 = vst [vmem:[%s4063_s6 + $0x1a0] sm:$0xff] %v1659_v26  ;;  %v1662_v50 = vmax.f32 %v1551_v14, 0.0  ;;  %v1394_v15 = vadd.f32 %v1393_v18, %v4123_v25  ;;  %v1554_v49 = vpop.f32.mrb[46].mxu1  ;;  %v1395_v20 = vpop.f32.mrb[47].mxu0 }
 0x22e   : > { %1789 = vst [vmem:[%s4063_s6 + $0x1b0] sm:$0xff] %v1661_v16  ;;  %1788 = vst [vmem:[%s4063_s6 + $0x1a8] sm:$0xff] %v1660_v60  ;;  %v1555_v59 = vadd.f32 %v1554_v49, %v4123_v25  ;;  %v1396_v24 = vadd.f32 %v1395_v20, %v4123_v25  ;;  %v1556_v63 = vpop.f32.mrb[47].mxu1 }
 0x22f   : > { %1790 = vst [vmem:[%s4063_s6 + $0x1b8] sm:$0xff] %v1662_v50  ;;  %v1667_v17 = vmax.f32 %v1394_v15, 0.0  ;;  %v1557_v12 = vadd.f32 %v1556_v63, %v4123_v25 }
 0x230   : > { %v1669_v47 = vmax.f32 %v1555_v59, 0.0  ;;  %v1668_v51 = vmax.f32 %v1396_v24, 0.0  ;;  %v1399_v35 = vpop.f32.mrb[48].mxu0 }
 0x231   : > { %1795 = vst [vmem:[%s4063_s6 + $0x1e0] sm:$0xff] %v1667_v17  ;;  %v1670_v43 = vmax.f32 %v1557_v12, 0.0  ;;  %v1400_v28 = vadd.f32 %v1399_v35, %v4133_v45  ;;  %v1560_v41 = vpop.f32.mrb[48].mxu1  ;;  %v1401_v36 = vpop.f32.mrb[49].mxu0 }
 0x232   : > { %1797 = vst [vmem:[%s4063_s6 + $0x1f0] sm:$0xff] %v1669_v47  ;;  %1796 = vst [vmem:[%s4063_s6 + $0x1e8] sm:$0xff] %v1668_v51  ;;  %v1561_v13 = vadd.f32 %v1560_v41, %v4133_v45  ;;  %v1402_v62 = vadd.f32 %v1401_v36, %v4133_v45  ;;  %v1562_v37 = vpop.f32.mrb[49].mxu1 }
 0x233   : > { %1798 = vst [vmem:[%s4063_s6 + $0x1f8] sm:$0xff] %v1670_v43  ;;  %v1675_v25 = vmax.f32 %v1400_v28, 0.0  ;;  %v1563_v52 = vadd.f32 %v1562_v37, %v4133_v45 }
 0x234   : > { %v1677_v7 = vmax.f32 %v1561_v13, 0.0  ;;  %v1676_v32 = vmax.f32 %v1402_v62, 0.0  ;;  %v1405_v29 = vpop.f32.mrb[50].mxu0 }
 0x235   : > { %1803 = vst [vmem:[%s4063_s6 + $0x220] sm:$0xff] %v1675_v25  ;;  %v1678_v44 = vmax.f32 %v1563_v52, 0.0  ;;  %v1406_v42 = vadd.f32 %v1405_v29, %v4143_v57  ;;  %v1566_v10 = vpop.f32.mrb[50].mxu1  ;;  %v1407_v40 = vpop.f32.mrb[51].mxu0 }
 0x236   : > { %1805 = vst [vmem:[%s4063_s6 + $0x230] sm:$0xff] %v1677_v7  ;;  %1804 = vst [vmem:[%s4063_s6 + $0x228] sm:$0xff] %v1676_v32  ;;  %v1567_v6 = vadd.f32 %v1566_v10, %v4143_v57  ;;  %v1408_v46 = vadd.f32 %v1407_v40, %v4143_v57  ;;  %v1568_v61 = vpop.f32.mrb[51].mxu1 }
 0x237   : > { %1806 = vst [vmem:[%s4063_s6 + $0x238] sm:$0xff] %v1678_v44  ;;  %v1683_v45 = vmax.f32 %v1406_v42, 0.0  ;;  %v1569_v58 = vadd.f32 %v1568_v61, %v4143_v57 }
 0x238   : > { %v1685_v53 = vmax.f32 %v1567_v6, 0.0  ;;  %v1684_v54 = vmax.f32 %v1408_v46, 0.0  ;;  %v1411_v56 = vpop.f32.mrb[52].mxu0 }
 0x239   : > { %1811 = vst [vmem:[%s4063_s6 + $0x260] sm:$0xff] %v1683_v45  ;;  %v1686_v48 = vmax.f32 %v1569_v58, 0.0  ;;  %v1412_v39 = vadd.f32 %v1411_v56, %v4153_v38  ;;  %v1572_v0 = vpop.f32.mrb[52].mxu1  ;;  %v1413_v1 = vpop.f32.mrb[53].mxu0 }
 0x23a   : > { %1813 = vst [vmem:[%s4063_s6 + $0x270] sm:$0xff] %v1685_v53  ;;  %1812 = vst [vmem:[%s4063_s6 + $0x268] sm:$0xff] %v1684_v54  ;;  %v1573_v5 = vadd.f32 %v1572_v0, %v4153_v38  ;;  %v1414_v2 = vadd.f32 %v1413_v1, %v4153_v38  ;;  %v1574_v27 = vpop.f32.mrb[53].mxu1 }
 0x23b   : > { %1814 = vst [vmem:[%s4063_s6 + $0x278] sm:$0xff] %v1686_v48  ;;  %v1691_v57 = vmax.f32 %v1412_v39, 0.0  ;;  %v1575_v3 = vadd.f32 %v1574_v27, %v4153_v38 }
 0x23c   : > { %v1693_v55 = vmax.f32 %v1573_v5, 0.0  ;;  %v1692_v4 = vmax.f32 %v1414_v2, 0.0  ;;  %v1417_v23 = vpop.f32.mrb[54].mxu0 }
 0x23d   : > { %1819 = vst [vmem:[%s4063_s6 + $0x2a0] sm:$0xff] %v1691_v57  ;;  %v1694_v9 = vmax.f32 %v1575_v3, 0.0  ;;  %v1418_v30 = vadd.f32 %v1417_v23, %v4163_v22  ;;  %v1578_v8 = vpop.f32.mrb[54].mxu1  ;;  %v1419_v31 = vpop.f32.mrb[55].mxu0 }
 0x23e   : > { %1821 = vst [vmem:[%s4063_s6 + $0x2b0] sm:$0xff] %v1693_v55  ;;  %1820 = vst [vmem:[%s4063_s6 + $0x2a8] sm:$0xff] %v1692_v4  ;;  %v1579_v11 = vadd.f32 %v1578_v8, %v4163_v22  ;;  %v1420_v26 = vadd.f32 %v1419_v31, %v4163_v22  ;;  %v1580_v14 = vpop.f32.mrb[55].mxu1 }
 0x23f   : > { %1822 = vst [vmem:[%s4063_s6 + $0x2b8] sm:$0xff] %v1694_v9  ;;  %v1699_v38 = vmax.f32 %v1418_v30, 0.0  ;;  %v1581_v16 = vadd.f32 %v1580_v14, %v4163_v22 }
 0x240   : > { %v1701_v60 = vmax.f32 %v1579_v11, 0.0  ;;  %v1700_v18 = vmax.f32 %v1420_v26, 0.0  ;;  %v1423_v50 = vpop.f32.mrb[56].mxu0 }
 0x241   : > { %1827 = vst [vmem:[%s4063_s6 + $0x2e0] sm:$0xff] %v1699_v38  ;;  %v1702_v15 = vmax.f32 %v1581_v16, 0.0  ;;  %v1424_v49 = vadd.f32 %v1423_v50, %v4173_v33  ;;  %v1584_v20 = vpop.f32.mrb[56].mxu1  ;;  %v1425_v59 = vpop.f32.mrb[57].mxu0 }
 0x242   : > { %1829 = vst [vmem:[%s4063_s6 + $0x2f0] sm:$0xff] %v1701_v60  ;;  %1828 = vst [vmem:[%s4063_s6 + $0x2e8] sm:$0xff] %v1700_v18  ;;  %v1585_v24 = vadd.f32 %v1584_v20, %v4173_v33  ;;  %v1426_v63 = vadd.f32 %v1425_v59, %v4173_v33  ;;  %v1586_v17 = vpop.f32.mrb[57].mxu1 }
 0x243   : > { %1830 = vst [vmem:[%s4063_s6 + $0x2f8] sm:$0xff] %v1702_v15  ;;  %v1707_v22 = vmax.f32 %v1424_v49, 0.0  ;;  %v1587_v12 = vadd.f32 %v1586_v17, %v4173_v33 }
 0x244   : > { %v1709_v47 = vmax.f32 %v1585_v24, 0.0  ;;  %v1708_v51 = vmax.f32 %v1426_v63, 0.0  ;;  %v1429_v35 = vpop.f32.mrb[58].mxu0 }
 0x245   : > { %1835 = vst [vmem:[%s4063_s6 + $0x320] sm:$0xff] %v1707_v22  ;;  %v1710_v43 = vmax.f32 %v1587_v12, 0.0  ;;  %v1430_v28 = vadd.f32 %v1429_v35, %v4183_v34  ;;  %v1590_v41 = vpop.f32.mrb[58].mxu1  ;;  %v1431_v36 = vpop.f32.mrb[59].mxu0 }
 0x246   : > { %1837 = vst [vmem:[%s4063_s6 + $0x330] sm:$0xff] %v1709_v47  ;;  %1836 = vst [vmem:[%s4063_s6 + $0x328] sm:$0xff] %v1708_v51  ;;  %v1591_v13 = vadd.f32 %v1590_v41, %v4183_v34  ;;  %v1432_v62 = vadd.f32 %v1431_v36, %v4183_v34  ;;  %v1592_v37 = vpop.f32.mrb[59].mxu1 }
 0x247   : > { %1838 = vst [vmem:[%s4063_s6 + $0x338] sm:$0xff] %v1710_v43  ;;  %v1715_v33 = vmax.f32 %v1430_v28, 0.0  ;;  %v1593_v25 = vadd.f32 %v1592_v37, %v4183_v34 }
 0x248   : > { %v1717_v52 = vmax.f32 %v1591_v13, 0.0  ;;  %v1716_v7 = vmax.f32 %v1432_v62, 0.0  ;;  %v1435_v32 = vpop.f32.mrb[60].mxu0 }
 0x249   : > { %1843 = vst [vmem:[%s4063_s6 + $0x360] sm:$0xff] %v1715_v33  ;;  %v1718_v29 = vmax.f32 %v1593_v25, 0.0  ;;  %v1436_v44 = vadd.f32 %v1435_v32, %v4193_v19  ;;  %v1596_v42 = vpop.f32.mrb[60].mxu1  ;;  %v1437_v10 = vpop.f32.mrb[61].mxu0 }
 0x24a   : > { %1845 = vst [vmem:[%s4063_s6 + $0x370] sm:$0xff] %v1717_v52  ;;  %1844 = vst [vmem:[%s4063_s6 + $0x368] sm:$0xff] %v1716_v7  ;;  %v1597_v40 = vadd.f32 %v1596_v42, %v4193_v19  ;;  %v1438_v6 = vadd.f32 %v1437_v10, %v4193_v19  ;;  %v1598_v46 = vpop.f32.mrb[61].mxu1 }
 0x24b   : > { %1846 = vst [vmem:[%s4063_s6 + $0x378] sm:$0xff] %v1718_v29  ;;  %v1723_v34 = vmax.f32 %v1436_v44, 0.0  ;;  %v1599_v61 = vadd.f32 %v1598_v46, %v4193_v19 }
 0x24c   : > { %v1725_v45 = vmax.f32 %v1597_v40, 0.0  ;;  %v1724_v58 = vmax.f32 %v1438_v6, 0.0  ;;  %v1441_v53 = vpop.f32.mrb[62].mxu0 }
 0x24d   : > { %1851 = vst [vmem:[%s4063_s6 + $0x3a0] sm:$0xff] %v1723_v34  ;;  %v1726_v54 = vmax.f32 %v1599_v61, 0.0  ;;  %v1442_v56 = vadd.f32 %v1441_v53, %v4203_v21  ;;  %v1602_v48 = vpop.f32.mrb[62].mxu1  ;;  %v1443_v39 = vpop.f32.mrb[63].mxu0  ;;  %1869 = sbr.rel (!%p3244_p9) target bundleno = 801 (0x321), region = 48 }
 0x24e   : > { %1853 = vst [vmem:[%s4063_s6 + $0x3b0] sm:$0xff] %v1725_v45  ;;  %1852 = vst [vmem:[%s4063_s6 + $0x3a8] sm:$0xff] %v1724_v58  ;;  %v1603_v0 = vadd.f32 %v1602_v48, %v4203_v21  ;;  %v1444_v1 = vadd.f32 %v1443_v39, %v4203_v21  ;;  %v1604_v19 = vpop.f32.mrb[63].mxu1 }
 0x24f   : > { %1854 = vst [vmem:[%s4063_s6 + $0x3b8] sm:$0xff] %v1726_v54  ;;  %v1731_v5 = vmax.f32 %v1442_v56, 0.0  ;;  %v1605_v2 = vadd.f32 %v1604_v19, %v4203_v21 }
 0x250   : > { %v1733_v27 = vmax.f32 %v1603_v0, 0.0  ;;  %v1732_v57 = vmax.f32 %v1444_v1, 0.0 }
 0x251   : > { %1859 = vst [vmem:[%s4063_s6 + $0x3e0] sm:$0xff] %v1731_v5  ;;  %v1734_v3 = vmax.f32 %v1605_v2, 0.0 }
 0x252   : > { %1861 = vst [vmem:[%s4063_s6 + $0x3f0] sm:$0xff] %v1733_v27  ;;  %1860 = vst [vmem:[%s4063_s6 + $0x3e8] sm:$0xff] %v1732_v57 }
 0x253   : > { %1862 = vst [vmem:[%s4063_s6 + $0x3f8] sm:$0xff] %v1734_v3 }
 0x254   : > { %s5067_s14 = smov (!%p1872_p8, %s1871_s14), 8 }
 0x255   : > { %s2637_s27 = sshll.u32 %s5067_s14, 11  ;;  %s4354_s7 = sshll.u32 %s5067_s14, 3 }
 0x256   : > { %p2641_p12 = scmp.eq.s32.totalorder %s2637_s27, 0 }
 0x257   : > { %p1884_p7 = scmp.lt.u32.totalorder (!%p2641_p12), %s4354_s7, 8 }
 0x258   : > { %1883 = sbr.rel (%p2641_p12) target bundleno = 801 (0x321), region = 52 }
 0x25f   : > { %1887 = sbr.rel (%p1884_p7) target bundleno = 781 (0x30d), region = 56  ;;  %s4358_s30 = sand.u32 (!%p1884_p7), 7, %s4354_s7  }
 0x260   : > { %p1933_p9 = scmp.eq.s32.totalorder (!%p1884_p7), %s4358_s30, 0  ;;  %p2642_p10 = scmp.ne.s32.totalorder (!%p1884_p7), %s4358_s30, 0 }
 0x266   : > { %1936 = sbr.rel (%p2642_p10) target bundleno = 688 (0x2b0), region = 71  ;;  %s1937_s21 = sshrl.u32 (!%p2642_p10), %s4354_s7, 3 }
 0x267   : > { %s4365_s8 = sshrl.u32 (!%p2642_p10), %s1937_s21, 2 }
 0x268   : > { %p2643_p11 = scmp.le.s32.totalorder (!%p2642_p10), %s4365_s8, 0 }
 0x26d   : > { %2476 = sbr.rel (%p2643_p11) target bundleno = 661 (0x295), region = 158  ;;  %s5041_s9 = smov (!%p2643_p11), %s4352_s26 }
 0x26e   : > { %s5042_s10 = smov (!%p2643_p11), %s4063_s6  ;;  %s4374_s12 = smov (!%p2643_p11), 0  }
 0x26f   : > { %s4376_s17 = smov (!%p2643_p11), 0  }
 0x274 LB: >> { %v1950_v21 = vld [vmem:[%s3103_s10] sm:$0xff]  ;;  %v1952_v55 = vld [vmem:[%s3103_s10 + $0x8] sm:$0xff]  ;;  %v1954_v4 = vld [vmem:[%s3103_s10 + $0x10] sm:$0xff]  ;;  %s2078_s18 = sadd.s32 1, %s3107_s12  ;;  %s1944_s17 = sadd.s32 1, %s3111_s17   ;;  %s3111_s17 = sphi %s4376_s17, %s1944_s17   ;;  %s3107_s12 = sphi %s4374_s12, %s5045_s12   ;;  %s3103_s10 = sphi %s5042_s10, %s5044_s10   ;;  %s3099_s9 = sphi %s5041_s9, %s5043_s9  }
 0x275   : >> { %1951 = vst [vmem:[%s3099_s9] sm:$0xff] %v1950_v21  ;;  %1953 = vst [vmem:[%s3099_s9 + $0x8] sm:$0xff] %v1952_v55  ;;  %v1956_v23 = vld [vmem:[%s3103_s10 + $0x18] sm:$0xff]  ;;  %v1958_v9 = vld [vmem:[%s3103_s10 + $0x40] sm:$0xff]  ;;  %p2079_p13 = scmp.ge.s32.totalorder %s2078_s18, %s4365_s8  ;;  %p1943_p0 = scmp.ge.s32.totalorder %s1944_s17, %s4365_s8 }
 0x276   : >> { %1955 = vst [vmem:[%s3099_s9 + $0x10] sm:$0xff] %v1954_v4  ;;  %v1960_v30 = vld [vmem:[%s3103_s10 + $0x48] sm:$0xff]  ;;  %1957 = vst [vmem:[%s3099_s9 + $0x18] sm:$0xff] %v1956_v23  ;;  %v1962_v8 = vld [vmem:[%s3103_s10 + $0x50] sm:$0xff] }
 0x277   : >> { %1959 = vst [vmem:[%s3099_s9 + $0xc8] sm:$0xff] %v1958_v9  ;;  %1961 = vst [vmem:[%s3099_s9 + $0xd0] sm:$0xff] %v1960_v30  ;;  %v1964_v31 = vld [vmem:[%s3103_s10 + $0x58] sm:$0xff]  ;;  %v1966_v11 = vld [vmem:[%s3103_s10 + $0x80] sm:$0xff]  ;;  %s5069_s18 = smov (%p2079_p13, %s2078_s18), 0 }
 0x278   : >> { %1963 = vst [vmem:[%s3099_s9 + $0xd8] sm:$0xff] %v1962_v8  ;;  %1965 = vst [vmem:[%s3099_s9 + $0xe0] sm:$0xff] %v1964_v31  ;;  %v1968_v26 = vld [vmem:[%s3103_s10 + $0x88] sm:$0xff]  ;;  %v1970_v14 = vld [vmem:[%s3103_s10 + $0x90] sm:$0xff]  ;;  %s2644_s24 = sshll.u32 %s5069_s18, 5  ;;  %s5045_s12 = smov %s5069_s18 }
 0x279   : >> { %1967 = vst [vmem:[%s3099_s9 + $0x190] sm:$0xff] %v1966_v11  ;;  %v1972_v38 = vld [vmem:[%s3103_s10 + $0x98] sm:$0xff]  ;;  %1969 = vst [vmem:[%s3099_s9 + $0x198] sm:$0xff] %v1968_v26  ;;  %v1974_v16 = vld [vmem:[%s3103_s10 + $0xc0] sm:$0xff]  ;;  %s4432_s11 = scalar_lea.vmem %s4063_s6, %s2644_s24 [#allocation4]   ;;  %s4435_s13 = scalar_lea.vmem %s4352_s26, %s2644_s24  }
 0x27a   : >> { %1971 = vst [vmem:[%s3099_s9 + $0x1a0] sm:$0xff] %v1970_v14  ;;  %1973 = vst [vmem:[%s3099_s9 + $0x1a8] sm:$0xff] %v1972_v38  ;;  %v1976_v60 = vld [vmem:[%s3103_s10 + $0xc8] sm:$0xff]  ;;  %v1978_v18 = vld [vmem:[%s3103_s10 + $0xd0] sm:$0xff] }
 0x27b   : >> { %1975 = vst [vmem:[%s3099_s9 + $0x258] sm:$0xff] %v1974_v16  ;;  %1977 = vst [vmem:[%s3099_s9 + $0x260] sm:$0xff] %v1976_v60  ;;  %v1980_v50 = vld [vmem:[%s3103_s10 + $0xd8] sm:$0xff]  ;;  %v1982_v15 = vld [vmem:[%s3103_s10 + $0x100] sm:$0xff] }
 0x27c   : >> { %1979 = vst [vmem:[%s3099_s9 + $0x268] sm:$0xff] %v1978_v18  ;;  %v1984_v49 = vld [vmem:[%s3103_s10 + $0x108] sm:$0xff]  ;;  %1981 = vst [vmem:[%s3099_s9 + $0x270] sm:$0xff] %v1980_v50  ;;  %v1986_v20 = vld [vmem:[%s3103_s10 + $0x110] sm:$0xff] }
 0x27d   : >> { %1983 = vst [vmem:[%s3099_s9 + $0x320] sm:$0xff] %v1982_v15  ;;  %1985 = vst [vmem:[%s3099_s9 + $0x328] sm:$0xff] %v1984_v49  ;;  %v1988_v59 = vld [vmem:[%s3103_s10 + $0x118] sm:$0xff]  ;;  %v1990_v24 = vld [vmem:[%s3103_s10 + $0x140] sm:$0xff] }
 0x27e   : >> { %1987 = vst [vmem:[%s3099_s9 + $0x330] sm:$0xff] %v1986_v20  ;;  %1989 = vst [vmem:[%s3099_s9 + $0x338] sm:$0xff] %v1988_v59  ;;  %v1992_v63 = vld [vmem:[%s3103_s10 + $0x148] sm:$0xff]  ;;  %v1994_v17 = vld [vmem:[%s3103_s10 + $0x150] sm:$0xff] }
 0x27f   : >> { %1991 = vst [vmem:[%s3099_s9 + $0x3e8] sm:$0xff] %v1990_v24  ;;  %v1996_v22 = vld [vmem:[%s3103_s10 + $0x158] sm:$0xff]  ;;  %1993 = vst [vmem:[%s3099_s9 + $0x3f0] sm:$0xff] %v1992_v63  ;;  %v1998_v12 = vld [vmem:[%s3103_s10 + $0x180] sm:$0xff] }
 0x280   : >> { %1995 = vst [vmem:[%s3099_s9 + $0x3f8] sm:$0xff] %v1994_v17  ;;  %1997 = vst [vmem:[%s3099_s9 + $0x400] sm:$0xff] %v1996_v22  ;;  %v2000_v47 = vld [vmem:[%s3103_s10 + $0x188] sm:$0xff]  ;;  %v2002_v51 = vld [vmem:[%s3103_s10 + $0x190] sm:$0xff] }
 0x281   : >> { %1999 = vst [vmem:[%s3099_s9 + $0x4b0] sm:$0xff] %v1998_v12  ;;  %2001 = vst [vmem:[%s3099_s9 + $0x4b8] sm:$0xff] %v2000_v47  ;;  %v2004_v35 = vld [vmem:[%s3103_s10 + $0x198] sm:$0xff]  ;;  %v2006_v43 = vld [vmem:[%s3103_s10 + $0x1c0] sm:$0xff] }
 0x282   : >> { %2003 = vst [vmem:[%s3099_s9 + $0x4c0] sm:$0xff] %v2002_v51  ;;  %v2008_v28 = vld [vmem:[%s3103_s10 + $0x1c8] sm:$0xff]  ;;  %2005 = vst [vmem:[%s3099_s9 + $0x4c8] sm:$0xff] %v2004_v35  ;;  %v2010_v41 = vld [vmem:[%s3103_s10 + $0x1d0] sm:$0xff] }
 0x283   : >> { %2007 = vst [vmem:[%s3099_s9 + $0x578] sm:$0xff] %v2006_v43  ;;  %2009 = vst [vmem:[%s3099_s9 + $0x580] sm:$0xff] %v2008_v28  ;;  %v2012_v36 = vld [vmem:[%s3103_s10 + $0x1d8] sm:$0xff]  ;;  %v2014_v13 = vld [vmem:[%s3103_s10 + $0x200] sm:$0xff] }
 0x284   : >> { %2011 = vst [vmem:[%s3099_s9 + $0x588] sm:$0xff] %v2010_v41  ;;  %2013 = vst [vmem:[%s3099_s9 + $0x590] sm:$0xff] %v2012_v36  ;;  %v2016_v62 = vld [vmem:[%s3103_s10 + $0x208] sm:$0xff]  ;;  %v2018_v37 = vld [vmem:[%s3103_s10 + $0x210] sm:$0xff] }
 0x285   : >> { %2015 = vst [vmem:[%s3099_s9 + $0x640] sm:$0xff] %v2014_v13  ;;  %v2020_v33 = vld [vmem:[%s3103_s10 + $0x218] sm:$0xff]  ;;  %2017 = vst [vmem:[%s3099_s9 + $0x648] sm:$0xff] %v2016_v62  ;;  %v2022_v25 = vld [vmem:[%s3103_s10 + $0x240] sm:$0xff] }
 0x286   : >> { %2019 = vst [vmem:[%s3099_s9 + $0x650] sm:$0xff] %v2018_v37  ;;  %2021 = vst [vmem:[%s3099_s9 + $0x658] sm:$0xff] %v2020_v33  ;;  %v2024_v52 = vld [vmem:[%s3103_s10 + $0x248] sm:$0xff]  ;;  %v2026_v7 = vld [vmem:[%s3103_s10 + $0x250] sm:$0xff] }
 0x287   : >> { %2023 = vst [vmem:[%s3099_s9 + $0x708] sm:$0xff] %v2022_v25  ;;  %2025 = vst [vmem:[%s3099_s9 + $0x710] sm:$0xff] %v2024_v52  ;;  %v2028_v32 = vld [vmem:[%s3103_s10 + $0x258] sm:$0xff]  ;;  %v2030_v29 = vld [vmem:[%s3103_s10 + $0x280] sm:$0xff] }
 0x288   : >> { %2027 = vst [vmem:[%s3099_s9 + $0x718] sm:$0xff] %v2026_v7  ;;  %v2032_v44 = vld [vmem:[%s3103_s10 + $0x288] sm:$0xff]  ;;  %2029 = vst [vmem:[%s3099_s9 + $0x720] sm:$0xff] %v2028_v32  ;;  %v2034_v42 = vld [vmem:[%s3103_s10 + $0x290] sm:$0xff] }
 0x289   : >> { %2031 = vst [vmem:[%s3099_s9 + $0x7d0] sm:$0xff] %v2030_v29  ;;  %2033 = vst [vmem:[%s3099_s9 + $0x7d8] sm:$0xff] %v2032_v44  ;;  %v2036_v10 = vld [vmem:[%s3103_s10 + $0x298] sm:$0xff]  ;;  %v2038_v40 = vld [vmem:[%s3103_s10 + $0x2c0] sm:$0xff] }
 0x28a   : >> { %2035 = vst [vmem:[%s3099_s9 + $0x7e0] sm:$0xff] %v2034_v42  ;;  %2037 = vst [vmem:[%s3099_s9 + $0x7e8] sm:$0xff] %v2036_v10  ;;  %v2040_v6 = vld [vmem:[%s3103_s10 + $0x2c8] sm:$0xff]  ;;  %v2042_v46 = vld [vmem:[%s3103_s10 + $0x2d0] sm:$0xff] }
 0x28b   : >> { %2039 = vst [vmem:[%s3099_s9 + $0x898] sm:$0xff] %v2038_v40  ;;  %v2044_v34 = vld [vmem:[%s3103_s10 + $0x2d8] sm:$0xff]  ;;  %2041 = vst [vmem:[%s3099_s9 + $0x8a0] sm:$0xff] %v2040_v6  ;;  %v2046_v61 = vld [vmem:[%s3103_s10 + $0x300] sm:$0xff] }
 0x28c   : >> { %2043 = vst [vmem:[%s3099_s9 + $0x8a8] sm:$0xff] %v2042_v46  ;;  %2045 = vst [vmem:[%s3099_s9 + $0x8b0] sm:$0xff] %v2044_v34  ;;  %v2048_v45 = vld [vmem:[%s3103_s10 + $0x308] sm:$0xff]  ;;  %v2050_v58 = vld [vmem:[%s3103_s10 + $0x310] sm:$0xff] }
 0x28d   : >> { %2047 = vst [vmem:[%s3099_s9 + $0x960] sm:$0xff] %v2046_v61  ;;  %2049 = vst [vmem:[%s3099_s9 + $0x968] sm:$0xff] %v2048_v45  ;;  %v2052_v53 = vld [vmem:[%s3103_s10 + $0x318] sm:$0xff]  ;;  %v2054_v54 = vld [vmem:[%s3103_s10 + $0x340] sm:$0xff] }
 0x28e   : >> { %2051 = vst [vmem:[%s3099_s9 + $0x970] sm:$0xff] %v2050_v58  ;;  %v2056_v56 = vld [vmem:[%s3103_s10 + $0x348] sm:$0xff]  ;;  %2053 = vst [vmem:[%s3099_s9 + $0x978] sm:$0xff] %v2052_v53  ;;  %v2058_v48 = vld [vmem:[%s3103_s10 + $0x350] sm:$0xff]  ;;  %1946 = sbr.rel (!%p1943_p0) target bundleno = 628 (0x274), region = 164 }
 0x28f   : >> { %2055 = vst [vmem:[%s3099_s9 + $0xa28] sm:$0xff] %v2054_v54  ;;  %2057 = vst [vmem:[%s3099_s9 + $0xa30] sm:$0xff] %v2056_v56  ;;  %v2060_v39 = vld [vmem:[%s3103_s10 + $0x358] sm:$0xff]  ;;  %v2062_v0 = vld [vmem:[%s3103_s10 + $0x380] sm:$0xff] }
 0x290   : >> { %2059 = vst [vmem:[%s3099_s9 + $0xa38] sm:$0xff] %v2058_v48  ;;  %2061 = vst [vmem:[%s3099_s9 + $0xa40] sm:$0xff] %v2060_v39  ;;  %v2064_v1 = vld [vmem:[%s3103_s10 + $0x388] sm:$0xff]  ;;  %v2066_v19 = vld [vmem:[%s3103_s10 + $0x390] sm:$0xff] }
 0x291   : >> { %2063 = vst [vmem:[%s3099_s9 + $0xaf0] sm:$0xff] %v2062_v0  ;;  %v2068_v5 = vld [vmem:[%s3103_s10 + $0x398] sm:$0xff]  ;;  %2065 = vst [vmem:[%s3099_s9 + $0xaf8] sm:$0xff] %v2064_v1  ;;  %v2070_v2 = vld [vmem:[%s3103_s10 + $0x3c0] sm:$0xff] }
 0x292   : >> { %2067 = vst [vmem:[%s3099_s9 + $0xb00] sm:$0xff] %v2066_v19  ;;  %2069 = vst [vmem:[%s3099_s9 + $0xb08] sm:$0xff] %v2068_v5  ;;  %v2072_v27 = vld [vmem:[%s3103_s10 + $0x3c8] sm:$0xff]  ;;  %v2074_v57 = vld [vmem:[%s3103_s10 + $0x3d0] sm:$0xff] }
 0x293   : >> { %2071 = vst [vmem:[%s3099_s9 + $0xbb8] sm:$0xff] %v2070_v2  ;;  %2073 = vst [vmem:[%s3099_s9 + $0xbc0] sm:$0xff] %v2072_v27  ;;  %v2076_v3 = vld [vmem:[%s3103_s10 + $0x3d8] sm:$0xff]  ;;  %s5044_s10 = smov %s4432_s11 }
 0x294   : >> { %2075 = vst [vmem:[%s3099_s9 + $0xbc8] sm:$0xff] %v2074_v57  ;;  %2077 = vst [vmem:[%s3099_s9 + $0xbd0] sm:$0xff] %v2076_v3  ;;  %s5043_s9 = smov %s4435_s13 }
 0x295 PF: > { %s4541_s28 = sand.u32 3, %s1937_s21   ;;  %s2666_s14 = sshll.u32 %s4365_s8, 9 }
 0x296   : > { %s2089_s15 = sshra.s32 %s2666_s14, 4  ;;  %p2649_p2 = scmp.le.s32.totalorder %s4541_s28, 0 }
 0x297   : > { %s4545_s16 = scalar_lea.vmem %s4063_s6, %s2089_s15 [#allocation4]   ;;  %s4548_s27 = scalar_lea.vmem %s4352_s26, %s2089_s15  }
 0x298   : > { %2490 = sbr.rel (%p2649_p2) target bundleno = 688 (0x2b0), region = 169  ;;  %s5046_s9 = smov (!%p2649_p2), %s4548_s27 }
 0x299   : > { %s5047_s10 = smov (!%p2649_p2), %s4545_s16  ;;  %s4557_s12 = smov (!%p2649_p2), 0  }
 0x29a   : > { %s4559_s17 = smov (!%p2649_p2), 0  }
 0x29f LB: >> { %v2105_v21 = vld [vmem:[%s3119_s10] sm:$0xff]  ;;  %s2137_s21 = sadd.s32 1, %s3123_s12  ;;  %s2099_s17 = sadd.s32 1, %s3127_s17   ;;  %s3127_s17 = sphi %s4559_s17, %s2099_s17   ;;  %s3123_s12 = sphi %s4557_s12, %s5048_s12   ;;  %s3119_s10 = sphi %s5047_s10, %s2142_s10   ;;  %s3115_s9 = sphi %s5046_s9, %s2143_s9  }
 0x2a0   : >> { %v2107_v55 = vld [vmem:[%s3119_s10 + $0x40] sm:$0xff]  ;;  %2106 = vst [vmem:[%s3115_s9] sm:$0xff] %v2105_v21  ;;  %p2138_p3 = scmp.ge.s32.totalorder %s2137_s21, %s4541_s28  ;;  %p2098_p4 = scmp.ge.s32.totalorder %s2099_s17, %s4541_s28 }
 0x2a1   : >> { %v2109_v4 = vld [vmem:[%s3119_s10 + $0x80] sm:$0xff]  ;;  %2108 = vst [vmem:[%s3115_s9 + $0xc8] sm:$0xff] %v2107_v55 }
 0x2a2   : >> { %2110 = vst [vmem:[%s3115_s9 + $0x190] sm:$0xff] %v2109_v4  ;;  %v2111_v23 = vld [vmem:[%s3119_s10 + $0xc0] sm:$0xff]  ;;  %s5071_s21 = smov (%p2138_p3, %s2137_s21), 0 }
 0x2a3   : >> { %v2113_v9 = vld [vmem:[%s3119_s10 + $0x100] sm:$0xff]  ;;  %2112 = vst [vmem:[%s3115_s9 + $0x258] sm:$0xff] %v2111_v23  ;;  %s2650_s8 = sshll.u32 %s5071_s21, 3  ;;  %s5048_s12 = smov %s5071_s21 }
 0x2a4   : >> { %v2115_v30 = vld [vmem:[%s3119_s10 + $0x140] sm:$0xff]  ;;  %2114 = vst [vmem:[%s3115_s9 + $0x320] sm:$0xff] %v2113_v9 }
 0x2a5   : >> { %2116 = vst [vmem:[%s3115_s9 + $0x3e8] sm:$0xff] %v2115_v30  ;;  %v2117_v8 = vld [vmem:[%s3119_s10 + $0x180] sm:$0xff] }
 0x2a6   : >> { %v2119_v31 = vld [vmem:[%s3119_s10 + $0x1c0] sm:$0xff]  ;;  %2118 = vst [vmem:[%s3115_s9 + $0x4b0] sm:$0xff] %v2117_v8 }
 0x2a7   : >> { %v2121_v11 = vld [vmem:[%s3119_s10 + $0x200] sm:$0xff]  ;;  %2120 = vst [vmem:[%s3115_s9 + $0x578] sm:$0xff] %v2119_v31 }
 0x2a8   : >> { %2122 = vst [vmem:[%s3115_s9 + $0x640] sm:$0xff] %v2121_v11  ;;  %v2123_v26 = vld [vmem:[%s3119_s10 + $0x240] sm:$0xff] }
 0x2a9   : >> { %v2125_v14 = vld [vmem:[%s3119_s10 + $0x280] sm:$0xff]  ;;  %2124 = vst [vmem:[%s3115_s9 + $0x708] sm:$0xff] %v2123_v26  ;;  %2101 = sbr.rel (!%p2098_p4) target bundleno = 671 (0x29f), region = 175 }
 0x2aa   : >> { %v2127_v38 = vld [vmem:[%s3119_s10 + $0x2c0] sm:$0xff]  ;;  %2126 = vst [vmem:[%s3115_s9 + $0x7d0] sm:$0xff] %v2125_v14 }
 0x2ab   : >> { %2128 = vst [vmem:[%s3115_s9 + $0x898] sm:$0xff] %v2127_v38  ;;  %v2129_v16 = vld [vmem:[%s3119_s10 + $0x300] sm:$0xff] }
 0x2ac   : >> { %v2131_v60 = vld [vmem:[%s3119_s10 + $0x340] sm:$0xff]  ;;  %2130 = vst [vmem:[%s3115_s9 + $0x960] sm:$0xff] %v2129_v16 }
 0x2ad   : >> { %v2133_v18 = vld [vmem:[%s3119_s10 + $0x380] sm:$0xff]  ;;  %2132 = vst [vmem:[%s3115_s9 + $0xa28] sm:$0xff] %v2131_v60 }
 0x2ae   : >> { %2134 = vst [vmem:[%s3115_s9 + $0xaf0] sm:$0xff] %v2133_v18  ;;  %v2135_v50 = vld [vmem:[%s3119_s10 + $0x3c0] sm:$0xff]  ;;  %s2142_s10 = scalar_lea.vmem %s4545_s16, %s2650_s8 [#allocation4]  }
 0x2af   : >> { %2136 = vst [vmem:[%s3115_s9 + $0xbb8] sm:$0xff] %v2135_v50  ;;  %s2143_s9 = scalar_lea.vmem %s4548_s27, %s2650_s8  }
 0x2b0 PF: > { %2146 = sbr.rel (%p1933_p9) target bundleno = 781 (0x30d), region = 89  ;;  %s2148_s18 = ssub.s32 (!%p1933_p9), %s4354_s7, %s4358_s30 }
 0x2b1   : > { %s2152_s24 = sshrl.u32 (!%p1933_p9), %s4354_s7, 3  ;;  %s4622_s11 = scalar_lea.vmem (!%p1933_p9), %s4063_s6, %s2148_s18 [#allocation4] }
 0x2b2   : > { %s4625_s13 = scalar_lea.vmem (!%p1933_p9), %s4352_s26, %s2148_s18  ;;  %s4629_s14 = sshrl.u32 (!%p1933_p9), %s2152_s24, 2 }
 0x2b3   : > { %p2652_p1 = scmp.le.s32.totalorder (!%p1933_p9), %s4629_s14, 0 }
 0x2b7   : > { %2504 = sbr.rel (%p2652_p1) target bundleno = 735 (0x2df), region = 180  ;;  %s5049_s28 = smov (!%p2652_p1), %s4352_s26 }
 0x2b8   : > { %s5050_s15 = smov (!%p2652_p1), %s4063_s6  ;;  %s4638_s16 = smov (!%p2652_p1), 0  }
 0x2b9   : > { %s4640_s27 = smov (!%p2652_p1), 0  }
 0x2be LB: >> { %v2165_v15 = vld [vmem:[%s3135_s15] sm:$0xff]  ;;  %v2167_v49 = vld [vmem:[%s3135_s15 + $0x8] sm:$0xff]  ;;  %v2169_v20 = vld [vmem:[%s3135_s15 + $0x10] sm:$0xff]  ;;  %s2293_s9 = sadd.s32 1, %s3139_s16  ;;  %s2159_s27 = sadd.s32 1, %s3143_s27   ;;  %s3143_s27 = sphi %s4640_s27, %s2159_s27   ;;  %s3139_s16 = sphi %s4638_s16, %s5053_s16   ;;  %s3135_s15 = sphi %s5050_s15, %s5052_s15   ;;  %s3131_s28 = sphi %s5049_s28, %s5051_s28  }
 0x2bf   : >> { %2166 = vst [vmem:[%s3131_s28] sm:$0xff] %v2165_v15  ;;  %2168 = vst [vmem:[%s3131_s28 + $0x8] sm:$0xff] %v2167_v49  ;;  %v2171_v59 = vld [vmem:[%s3135_s15 + $0x18] sm:$0xff]  ;;  %v2173_v24 = vld [vmem:[%s3135_s15 + $0x40] sm:$0xff]  ;;  %p2294_p5 = scmp.ge.s32.totalorder %s2293_s9, %s4629_s14  ;;  %p2158_p6 = scmp.ge.s32.totalorder %s2159_s27, %s4629_s14 }
 0x2c0   : >> { %2170 = vst [vmem:[%s3131_s28 + $0x10] sm:$0xff] %v2169_v20  ;;  %v2175_v63 = vld [vmem:[%s3135_s15 + $0x48] sm:$0xff]  ;;  %2172 = vst [vmem:[%s3131_s28 + $0x18] sm:$0xff] %v2171_v59  ;;  %v2177_v17 = vld [vmem:[%s3135_s15 + $0x50] sm:$0xff] }
 0x2c1   : >> { %2174 = vst [vmem:[%s3131_s28 + $0xc8] sm:$0xff] %v2173_v24  ;;  %2176 = vst [vmem:[%s3131_s28 + $0xd0] sm:$0xff] %v2175_v63  ;;  %v2179_v22 = vld [vmem:[%s3135_s15 + $0x58] sm:$0xff]  ;;  %v2181_v12 = vld [vmem:[%s3135_s15 + $0x80] sm:$0xff]  ;;  %s5073_s9 = smov (%p2294_p5, %s2293_s9), 0 }
 0x2c2   : >> { %2178 = vst [vmem:[%s3131_s28 + $0xd8] sm:$0xff] %v2177_v17  ;;  %2180 = vst [vmem:[%s3131_s28 + $0xe0] sm:$0xff] %v2179_v22  ;;  %v2183_v47 = vld [vmem:[%s3135_s15 + $0x88] sm:$0xff]  ;;  %v2185_v51 = vld [vmem:[%s3135_s15 + $0x90] sm:$0xff]  ;;  %s2653_s10 = sshll.u32 %s5073_s9, 5  ;;  %s5053_s16 = smov %s5073_s9 }
 0x2c3   : >> { %2182 = vst [vmem:[%s3131_s28 + $0x190] sm:$0xff] %v2181_v12  ;;  %v2187_v35 = vld [vmem:[%s3135_s15 + $0x98] sm:$0xff]  ;;  %2184 = vst [vmem:[%s3131_s28 + $0x198] sm:$0xff] %v2183_v47  ;;  %v2189_v43 = vld [vmem:[%s3135_s15 + $0xc0] sm:$0xff]  ;;  %s4696_s12 = scalar_lea.vmem %s4063_s6, %s2653_s10 [#allocation4]   ;;  %s4699_s17 = scalar_lea.vmem %s4352_s26, %s2653_s10  }
 0x2c4   : >> { %2186 = vst [vmem:[%s3131_s28 + $0x1a0] sm:$0xff] %v2185_v51  ;;  %2188 = vst [vmem:[%s3131_s28 + $0x1a8] sm:$0xff] %v2187_v35  ;;  %v2191_v28 = vld [vmem:[%s3135_s15 + $0xc8] sm:$0xff]  ;;  %v2193_v41 = vld [vmem:[%s3135_s15 + $0xd0] sm:$0xff] }
 0x2c5   : >> { %2190 = vst [vmem:[%s3131_s28 + $0x258] sm:$0xff] %v2189_v43  ;;  %2192 = vst [vmem:[%s3131_s28 + $0x260] sm:$0xff] %v2191_v28  ;;  %v2195_v36 = vld [vmem:[%s3135_s15 + $0xd8] sm:$0xff]  ;;  %v2197_v13 = vld [vmem:[%s3135_s15 + $0x100] sm:$0xff] }
 0x2c6   : >> { %2194 = vst [vmem:[%s3131_s28 + $0x268] sm:$0xff] %v2193_v41  ;;  %v2199_v62 = vld [vmem:[%s3135_s15 + $0x108] sm:$0xff]  ;;  %2196 = vst [vmem:[%s3131_s28 + $0x270] sm:$0xff] %v2195_v36  ;;  %v2201_v37 = vld [vmem:[%s3135_s15 + $0x110] sm:$0xff] }
 0x2c7   : >> { %2198 = vst [vmem:[%s3131_s28 + $0x320] sm:$0xff] %v2197_v13  ;;  %2200 = vst [vmem:[%s3131_s28 + $0x328] sm:$0xff] %v2199_v62  ;;  %v2203_v33 = vld [vmem:[%s3135_s15 + $0x118] sm:$0xff]  ;;  %v2205_v25 = vld [vmem:[%s3135_s15 + $0x140] sm:$0xff] }
 0x2c8   : >> { %2202 = vst [vmem:[%s3131_s28 + $0x330] sm:$0xff] %v2201_v37  ;;  %2204 = vst [vmem:[%s3131_s28 + $0x338] sm:$0xff] %v2203_v33  ;;  %v2207_v52 = vld [vmem:[%s3135_s15 + $0x148] sm:$0xff]  ;;  %v2209_v7 = vld [vmem:[%s3135_s15 + $0x150] sm:$0xff] }
 0x2c9   : >> { %2206 = vst [vmem:[%s3131_s28 + $0x3e8] sm:$0xff] %v2205_v25  ;;  %v2211_v32 = vld [vmem:[%s3135_s15 + $0x158] sm:$0xff]  ;;  %2208 = vst [vmem:[%s3131_s28 + $0x3f0] sm:$0xff] %v2207_v52  ;;  %v2213_v29 = vld [vmem:[%s3135_s15 + $0x180] sm:$0xff] }
 0x2ca   : >> { %2210 = vst [vmem:[%s3131_s28 + $0x3f8] sm:$0xff] %v2209_v7  ;;  %2212 = vst [vmem:[%s3131_s28 + $0x400] sm:$0xff] %v2211_v32  ;;  %v2215_v44 = vld [vmem:[%s3135_s15 + $0x188] sm:$0xff]  ;;  %v2217_v42 = vld [vmem:[%s3135_s15 + $0x190] sm:$0xff] }
 0x2cb   : >> { %2214 = vst [vmem:[%s3131_s28 + $0x4b0] sm:$0xff] %v2213_v29  ;;  %2216 = vst [vmem:[%s3131_s28 + $0x4b8] sm:$0xff] %v2215_v44  ;;  %v2219_v10 = vld [vmem:[%s3135_s15 + $0x198] sm:$0xff]  ;;  %v2221_v40 = vld [vmem:[%s3135_s15 + $0x1c0] sm:$0xff] }
 0x2cc   : >> { %2218 = vst [vmem:[%s3131_s28 + $0x4c0] sm:$0xff] %v2217_v42  ;;  %v2223_v6 = vld [vmem:[%s3135_s15 + $0x1c8] sm:$0xff]  ;;  %2220 = vst [vmem:[%s3131_s28 + $0x4c8] sm:$0xff] %v2219_v10  ;;  %v2225_v46 = vld [vmem:[%s3135_s15 + $0x1d0] sm:$0xff] }
 0x2cd   : >> { %2222 = vst [vmem:[%s3131_s28 + $0x578] sm:$0xff] %v2221_v40  ;;  %2224 = vst [vmem:[%s3131_s28 + $0x580] sm:$0xff] %v2223_v6  ;;  %v2227_v34 = vld [vmem:[%s3135_s15 + $0x1d8] sm:$0xff]  ;;  %v2229_v61 = vld [vmem:[%s3135_s15 + $0x200] sm:$0xff] }
 0x2ce   : >> { %2226 = vst [vmem:[%s3131_s28 + $0x588] sm:$0xff] %v2225_v46  ;;  %2228 = vst [vmem:[%s3131_s28 + $0x590] sm:$0xff] %v2227_v34  ;;  %v2231_v45 = vld [vmem:[%s3135_s15 + $0x208] sm:$0xff]  ;;  %v2233_v58 = vld [vmem:[%s3135_s15 + $0x210] sm:$0xff] }
 0x2cf   : >> { %2230 = vst [vmem:[%s3131_s28 + $0x640] sm:$0xff] %v2229_v61  ;;  %v2235_v53 = vld [vmem:[%s3135_s15 + $0x218] sm:$0xff]  ;;  %2232 = vst [vmem:[%s3131_s28 + $0x648] sm:$0xff] %v2231_v45  ;;  %v2237_v54 = vld [vmem:[%s3135_s15 + $0x240] sm:$0xff] }
 0x2d0   : >> { %2234 = vst [vmem:[%s3131_s28 + $0x650] sm:$0xff] %v2233_v58  ;;  %2236 = vst [vmem:[%s3131_s28 + $0x658] sm:$0xff] %v2235_v53  ;;  %v2239_v56 = vld [vmem:[%s3135_s15 + $0x248] sm:$0xff]  ;;  %v2241_v48 = vld [vmem:[%s3135_s15 + $0x250] sm:$0xff] }
 0x2d1   : >> { %2238 = vst [vmem:[%s3131_s28 + $0x708] sm:$0xff] %v2237_v54  ;;  %2240 = vst [vmem:[%s3131_s28 + $0x710] sm:$0xff] %v2239_v56  ;;  %v2243_v39 = vld [vmem:[%s3135_s15 + $0x258] sm:$0xff]  ;;  %v2245_v0 = vld [vmem:[%s3135_s15 + $0x280] sm:$0xff] }
 0x2d2   : >> { %2242 = vst [vmem:[%s3131_s28 + $0x718] sm:$0xff] %v2241_v48  ;;  %v2247_v1 = vld [vmem:[%s3135_s15 + $0x288] sm:$0xff]  ;;  %2244 = vst [vmem:[%s3131_s28 + $0x720] sm:$0xff] %v2243_v39  ;;  %v2249_v19 = vld [vmem:[%s3135_s15 + $0x290] sm:$0xff] }
 0x2d3   : >> { %2246 = vst [vmem:[%s3131_s28 + $0x7d0] sm:$0xff] %v2245_v0  ;;  %2248 = vst [vmem:[%s3131_s28 + $0x7d8] sm:$0xff] %v2247_v1  ;;  %v2251_v5 = vld [vmem:[%s3135_s15 + $0x298] sm:$0xff]  ;;  %v2253_v2 = vld [vmem:[%s3135_s15 + $0x2c0] sm:$0xff] }
 0x2d4   : >> { %2250 = vst [vmem:[%s3131_s28 + $0x7e0] sm:$0xff] %v2249_v19  ;;  %2252 = vst [vmem:[%s3131_s28 + $0x7e8] sm:$0xff] %v2251_v5  ;;  %v2255_v27 = vld [vmem:[%s3135_s15 + $0x2c8] sm:$0xff]  ;;  %v2257_v57 = vld [vmem:[%s3135_s15 + $0x2d0] sm:$0xff] }
 0x2d5   : >> { %2254 = vst [vmem:[%s3131_s28 + $0x898] sm:$0xff] %v2253_v2  ;;  %v2259_v3 = vld [vmem:[%s3135_s15 + $0x2d8] sm:$0xff]  ;;  %2256 = vst [vmem:[%s3131_s28 + $0x8a0] sm:$0xff] %v2255_v27  ;;  %v2261_v21 = vld [vmem:[%s3135_s15 + $0x300] sm:$0xff] }
 0x2d6   : >> { %2258 = vst [vmem:[%s3131_s28 + $0x8a8] sm:$0xff] %v2257_v57  ;;  %2260 = vst [vmem:[%s3131_s28 + $0x8b0] sm:$0xff] %v2259_v3  ;;  %v2263_v55 = vld [vmem:[%s3135_s15 + $0x308] sm:$0xff]  ;;  %v2265_v4 = vld [vmem:[%s3135_s15 + $0x310] sm:$0xff] }
 0x2d7   : >> { %2262 = vst [vmem:[%s3131_s28 + $0x960] sm:$0xff] %v2261_v21  ;;  %2264 = vst [vmem:[%s3131_s28 + $0x968] sm:$0xff] %v2263_v55  ;;  %v2267_v23 = vld [vmem:[%s3135_s15 + $0x318] sm:$0xff]  ;;  %v2269_v9 = vld [vmem:[%s3135_s15 + $0x340] sm:$0xff] }
 0x2d8   : >> { %2266 = vst [vmem:[%s3131_s28 + $0x970] sm:$0xff] %v2265_v4  ;;  %v2271_v30 = vld [vmem:[%s3135_s15 + $0x348] sm:$0xff]  ;;  %2268 = vst [vmem:[%s3131_s28 + $0x978] sm:$0xff] %v2267_v23  ;;  %v2273_v8 = vld [vmem:[%s3135_s15 + $0x350] sm:$0xff]  ;;  %2161 = sbr.rel (!%p2158_p6) target bundleno = 702 (0x2be), region = 186 }
 0x2d9   : >> { %2270 = vst [vmem:[%s3131_s28 + $0xa28] sm:$0xff] %v2269_v9  ;;  %2272 = vst [vmem:[%s3131_s28 + $0xa30] sm:$0xff] %v2271_v30  ;;  %v2275_v31 = vld [vmem:[%s3135_s15 + $0x358] sm:$0xff]  ;;  %v2277_v11 = vld [vmem:[%s3135_s15 + $0x380] sm:$0xff] }
 0x2da   : >> { %2274 = vst [vmem:[%s3131_s28 + $0xa38] sm:$0xff] %v2273_v8  ;;  %2276 = vst [vmem:[%s3131_s28 + $0xa40] sm:$0xff] %v2275_v31  ;;  %v2279_v26 = vld [vmem:[%s3135_s15 + $0x388] sm:$0xff]  ;;  %v2281_v14 = vld [vmem:[%s3135_s15 + $0x390] sm:$0xff] }
 0x2db   : >> { %2278 = vst [vmem:[%s3131_s28 + $0xaf0] sm:$0xff] %v2277_v11  ;;  %v2283_v38 = vld [vmem:[%s3135_s15 + $0x398] sm:$0xff]  ;;  %2280 = vst [vmem:[%s3131_s28 + $0xaf8] sm:$0xff] %v2279_v26  ;;  %v2285_v16 = vld [vmem:[%s3135_s15 + $0x3c0] sm:$0xff] }
 0x2dc   : >> { %2282 = vst [vmem:[%s3131_s28 + $0xb00] sm:$0xff] %v2281_v14  ;;  %2284 = vst [vmem:[%s3131_s28 + $0xb08] sm:$0xff] %v2283_v38  ;;  %v2287_v60 = vld [vmem:[%s3135_s15 + $0x3c8] sm:$0xff]  ;;  %v2289_v18 = vld [vmem:[%s3135_s15 + $0x3d0] sm:$0xff] }
 0x2dd   : >> { %2286 = vst [vmem:[%s3131_s28 + $0xbb8] sm:$0xff] %v2285_v16  ;;  %2288 = vst [vmem:[%s3131_s28 + $0xbc0] sm:$0xff] %v2287_v60  ;;  %v2291_v50 = vld [vmem:[%s3135_s15 + $0x3d8] sm:$0xff]  ;;  %s5052_s15 = smov %s4696_s12 }
 0x2de   : >> { %2290 = vst [vmem:[%s3131_s28 + $0xbc8] sm:$0xff] %v2289_v18  ;;  %2292 = vst [vmem:[%s3131_s28 + $0xbd0] sm:$0xff] %v2291_v50  ;;  %s5051_s28 = smov %s4699_s17 }
 0x2df PF: > { %s4805_s21 = sand.u32 3, %s2152_s24   ;;  %s2668_s8 = sshll.u32 %s4629_s14, 9 }
 0x2e0   : > { %s2304_s18 = sshra.s32 %s2668_s8, 4  ;;  %p2658_p8 = scmp.le.s32.totalorder %s4805_s21, 0 }
 0x2e1   : > { %s4809_s10 = scalar_lea.vmem %s4063_s6, %s2304_s18 [#allocation4]   ;;  %s4812_s17 = scalar_lea.vmem %s4352_s26, %s2304_s18  }
 0x2e2   : > { %2518 = sbr.rel (%p2658_p8) target bundleno = 762 (0x2fa), region = 191  ;;  %s5054_s28 = smov (!%p2658_p8), %s4812_s17 }
 0x2e3   : > { %s5055_s15 = smov (!%p2658_p8), %s4809_s10  ;;  %s4821_s16 = smov (!%p2658_p8), 0  }
 0x2e4   : > { %s4823_s27 = smov (!%p2658_p8), 0  }
 0x2e9 LB: >> { %v2320_v15 = vld [vmem:[%s3151_s15] sm:$0xff]  ;;  %s2352_s24 = sadd.s32 1, %s3155_s16  ;;  %s2314_s27 = sadd.s32 1, %s3159_s27   ;;  %s3159_s27 = sphi %s4823_s27, %s2314_s27   ;;  %s3155_s16 = sphi %s4821_s16, %s5056_s16   ;;  %s3151_s15 = sphi %s5055_s15, %s2357_s15   ;;  %s3147_s28 = sphi %s5054_s28, %s2358_s28  }
 0x2ea   : >> { %v2322_v49 = vld [vmem:[%s3151_s15 + $0x40] sm:$0xff]  ;;  %2321 = vst [vmem:[%s3147_s28] sm:$0xff] %v2320_v15  ;;  %p2353_p12 = scmp.ge.s32.totalorder %s2352_s24, %s4805_s21  ;;  %p2313_p7 = scmp.ge.s32.totalorder %s2314_s27, %s4805_s21 }
 0x2eb   : >> { %v2324_v20 = vld [vmem:[%s3151_s15 + $0x80] sm:$0xff]  ;;  %2323 = vst [vmem:[%s3147_s28 + $0xc8] sm:$0xff] %v2322_v49 }
 0x2ec   : >> { %2325 = vst [vmem:[%s3147_s28 + $0x190] sm:$0xff] %v2324_v20  ;;  %v2326_v59 = vld [vmem:[%s3151_s15 + $0xc0] sm:$0xff]  ;;  %s5075_s24 = smov (%p2353_p12, %s2352_s24), 0 }
 0x2ed   : >> { %v2328_v24 = vld [vmem:[%s3151_s15 + $0x100] sm:$0xff]  ;;  %2327 = vst [vmem:[%s3147_s28 + $0x258] sm:$0xff] %v2326_v59  ;;  %s2659_s14 = sshll.u32 %s5075_s24, 3  ;;  %s5056_s16 = smov %s5075_s24 }
 0x2ee   : >> { %v2330_v63 = vld [vmem:[%s3151_s15 + $0x140] sm:$0xff]  ;;  %2329 = vst [vmem:[%s3147_s28 + $0x320] sm:$0xff] %v2328_v24 }
 0x2ef   : >> { %2331 = vst [vmem:[%s3147_s28 + $0x3e8] sm:$0xff] %v2330_v63  ;;  %v2332_v17 = vld [vmem:[%s3151_s15 + $0x180] sm:$0xff] }
 0x2f0   : >> { %v2334_v22 = vld [vmem:[%s3151_s15 + $0x1c0] sm:$0xff]  ;;  %2333 = vst [vmem:[%s3147_s28 + $0x4b0] sm:$0xff] %v2332_v17 }
 0x2f1   : >> { %v2336_v12 = vld [vmem:[%s3151_s15 + $0x200] sm:$0xff]  ;;  %2335 = vst [vmem:[%s3147_s28 + $0x578] sm:$0xff] %v2334_v22 }
 0x2f2   : >> { %2337 = vst [vmem:[%s3147_s28 + $0x640] sm:$0xff] %v2336_v12  ;;  %v2338_v47 = vld [vmem:[%s3151_s15 + $0x240] sm:$0xff] }
 0x2f3   : >> { %v2340_v51 = vld [vmem:[%s3151_s15 + $0x280] sm:$0xff]  ;;  %2339 = vst [vmem:[%s3147_s28 + $0x708] sm:$0xff] %v2338_v47  ;;  %2316 = sbr.rel (!%p2313_p7) target bundleno = 745 (0x2e9), region = 197 }
 0x2f4   : >> { %v2342_v35 = vld [vmem:[%s3151_s15 + $0x2c0] sm:$0xff]  ;;  %2341 = vst [vmem:[%s3147_s28 + $0x7d0] sm:$0xff] %v2340_v51 }
 0x2f5   : >> { %2343 = vst [vmem:[%s3147_s28 + $0x898] sm:$0xff] %v2342_v35  ;;  %v2344_v43 = vld [vmem:[%s3151_s15 + $0x300] sm:$0xff] }
 0x2f6   : >> { %v2346_v28 = vld [vmem:[%s3151_s15 + $0x340] sm:$0xff]  ;;  %2345 = vst [vmem:[%s3147_s28 + $0x960] sm:$0xff] %v2344_v43 }
 0x2f7   : >> { %v2348_v41 = vld [vmem:[%s3151_s15 + $0x380] sm:$0xff]  ;;  %2347 = vst [vmem:[%s3147_s28 + $0xa28] sm:$0xff] %v2346_v28 }
 0x2f8   : >> { %2349 = vst [vmem:[%s3147_s28 + $0xaf0] sm:$0xff] %v2348_v41  ;;  %v2350_v36 = vld [vmem:[%s3151_s15 + $0x3c0] sm:$0xff]  ;;  %s2357_s15 = scalar_lea.vmem %s4809_s10, %s2659_s14 [#allocation4]  }
 0x2f9   : >> { %2351 = vst [vmem:[%s3147_s28 + $0xbb8] sm:$0xff] %v2350_v36  ;;  %s2358_s28 = scalar_lea.vmem %s4812_s17, %s2659_s14  }
 0x2fa PF: > { %s3166_s9 = smov 0  }
 0x2fb   : > { %s4881_s12 = sshllo.u32 %s3166_s9, %s4358_s30 }
 0x2fc   : > { %v2368_v13 = vld [vmem:[%s4622_s11] sm:%s4881_s12] }
 0x2fd   : > { %v2370_v62 = vld [vmem:[%s4622_s11 + $0x40] sm:%s4881_s12]  ;;  %2369 = vst [vmem:[%s4625_s13] sm:%s4881_s12] %v2368_v13 }
 0x2fe   : > { %2371 = vst [vmem:[%s4625_s13 + $0xc8] sm:%s4881_s12] %v2370_v62  ;;  %v2372_v37 = vld [vmem:[%s4622_s11 + $0x80] sm:%s4881_s12] }
 0x2ff   : > { %v2374_v33 = vld [vmem:[%s4622_s11 + $0xc0] sm:%s4881_s12]  ;;  %2373 = vst [vmem:[%s4625_s13 + $0x190] sm:%s4881_s12] %v2372_v37 }
 0x300   : > { %2375 = vst [vmem:[%s4625_s13 + $0x258] sm:%s4881_s12] %v2374_v33  ;;  %v2376_v25 = vld [vmem:[%s4622_s11 + $0x100] sm:%s4881_s12] }
 0x301   : > { %v2378_v52 = vld [vmem:[%s4622_s11 + $0x140] sm:%s4881_s12]  ;;  %2377 = vst [vmem:[%s4625_s13 + $0x320] sm:%s4881_s12] %v2376_v25 }
 0x302   : > { %2379 = vst [vmem:[%s4625_s13 + $0x3e8] sm:%s4881_s12] %v2378_v52  ;;  %v2380_v7 = vld [vmem:[%s4622_s11 + $0x180] sm:%s4881_s12] }
 0x303   : > { %v2382_v32 = vld [vmem:[%s4622_s11 + $0x1c0] sm:%s4881_s12]  ;;  %2381 = vst [vmem:[%s4625_s13 + $0x4b0] sm:%s4881_s12] %v2380_v7 }
 0x304   : > { %2383 = vst [vmem:[%s4625_s13 + $0x578] sm:%s4881_s12] %v2382_v32  ;;  %v2384_v29 = vld [vmem:[%s4622_s11 + $0x200] sm:%s4881_s12] }
 0x305   : > { %v2386_v44 = vld [vmem:[%s4622_s11 + $0x240] sm:%s4881_s12]  ;;  %2385 = vst [vmem:[%s4625_s13 + $0x640] sm:%s4881_s12] %v2384_v29 }
 0x306   : > { %2387 = vst [vmem:[%s4625_s13 + $0x708] sm:%s4881_s12] %v2386_v44  ;;  %v2388_v42 = vld [vmem:[%s4622_s11 + $0x280] sm:%s4881_s12] }
 0x307   : > { %v2390_v10 = vld [vmem:[%s4622_s11 + $0x2c0] sm:%s4881_s12]  ;;  %2389 = vst [vmem:[%s4625_s13 + $0x7d0] sm:%s4881_s12] %v2388_v42 }
 0x308   : > { %2391 = vst [vmem:[%s4625_s13 + $0x898] sm:%s4881_s12] %v2390_v10  ;;  %v2392_v40 = vld [vmem:[%s4622_s11 + $0x300] sm:%s4881_s12] }
 0x309   : > { %v2394_v6 = vld [vmem:[%s4622_s11 + $0x340] sm:%s4881_s12]  ;;  %2393 = vst [vmem:[%s4625_s13 + $0x960] sm:%s4881_s12] %v2392_v40 }
 0x30a   : > { %2395 = vst [vmem:[%s4625_s13 + $0xa28] sm:%s4881_s12] %v2394_v6  ;;  %v2396_v46 = vld [vmem:[%s4622_s11 + $0x380] sm:%s4881_s12] }
 0x30b   : > { %v2398_v34 = vld [vmem:[%s4622_s11 + $0x3c0] sm:%s4881_s12]  ;;  %2397 = vst [vmem:[%s4625_s13 + $0xaf0] sm:%s4881_s12] %v2396_v46 }
 0x30c   : > { %2399 = vst [vmem:[%s4625_s13 + $0xbb8] sm:%s4881_s12] %v2398_v34 }
 0x30d PF: > { %p2661_p9 = scmp.ge.u32.totalorder %s4354_s7, 8 }
 0x30e   : > { %s3167_s30 = smov (!%p2661_p9), 0  }
 0x30f   : > { %1890 = sbr.rel (%p2661_p9) target bundleno = 801 (0x321), region = 60  ;;  %s4949_s11 = sshllo.u32 (!%p2661_p9), %s3167_s30, %s4354_s7 }
 0x310   : > { %v1900_v61 = vld [vmem:[%s4063_s6] sm:%s4949_s11] (!%p2661_p9) }
 0x311   : > { %v1902_v45 = vld [vmem:[%s4063_s6 + $0x40] sm:%s4949_s11] (!%p2661_p9)  ;;  %1901 = vst [vmem:[%s4352_s26] sm:%s4949_s11] (!%p2661_p9), %v1900_v61 }
 0x312   : > { %1903 = vst [vmem:[%s4352_s26 + $0xc8] sm:%s4949_s11] (!%p2661_p9), %v1902_v45  ;;  %v1904_v58 = vld [vmem:[%s4063_s6 + $0x80] sm:%s4949_s11] (!%p2661_p9) }
 0x313   : > { %v1906_v53 = vld [vmem:[%s4063_s6 + $0xc0] sm:%s4949_s11] (!%p2661_p9)  ;;  %1905 = vst [vmem:[%s4352_s26 + $0x190] sm:%s4949_s11] (!%p2661_p9), %v1904_v58 }
 0x314   : > { %1907 = vst [vmem:[%s4352_s26 + $0x258] sm:%s4949_s11] (!%p2661_p9), %v1906_v53  ;;  %v1908_v54 = vld [vmem:[%s4063_s6 + $0x100] sm:%s4949_s11] (!%p2661_p9) }
 0x315   : > { %v1910_v56 = vld [vmem:[%s4063_s6 + $0x140] sm:%s4949_s11] (!%p2661_p9)  ;;  %1909 = vst [vmem:[%s4352_s26 + $0x320] sm:%s4949_s11] (!%p2661_p9), %v1908_v54 }
 0x316   : > { %1911 = vst [vmem:[%s4352_s26 + $0x3e8] sm:%s4949_s11] %v1910_v56  ;;  %v1912_v48 = vld [vmem:[%s4063_s6 + $0x180] sm:%s4949_s11] }
 0x317   : > { %v1914_v39 = vld [vmem:[%s4063_s6 + $0x1c0] sm:%s4949_s11]  ;;  %1913 = vst [vmem:[%s4352_s26 + $0x4b0] sm:%s4949_s11] %v1912_v48 }
 0x318   : > { %1915 = vst [vmem:[%s4352_s26 + $0x578] sm:%s4949_s11] %v1914_v39  ;;  %v1916_v0 = vld [vmem:[%s4063_s6 + $0x200] sm:%s4949_s11] }
 0x319   : > { %v1918_v1 = vld [vmem:[%s4063_s6 + $0x240] sm:%s4949_s11]  ;;  %1917 = vst [vmem:[%s4352_s26 + $0x640] sm:%s4949_s11] %v1916_v0 }
 0x31a   : > { %1919 = vst [vmem:[%s4352_s26 + $0x708] sm:%s4949_s11] %v1918_v1  ;;  %v1920_v19 = vld [vmem:[%s4063_s6 + $0x280] sm:%s4949_s11] }
 0x31b   : > { %v1922_v5 = vld [vmem:[%s4063_s6 + $0x2c0] sm:%s4949_s11]  ;;  %1921 = vst [vmem:[%s4352_s26 + $0x7d0] sm:%s4949_s11] %v1920_v19 }
 0x31c   : > { %1923 = vst [vmem:[%s4352_s26 + $0x898] sm:%s4949_s11] %v1922_v5  ;;  %v1924_v2 = vld [vmem:[%s4063_s6 + $0x300] sm:%s4949_s11] }
 0x31d   : > { %v1926_v27 = vld [vmem:[%s4063_s6 + $0x340] sm:%s4949_s11]  ;;  %1925 = vst [vmem:[%s4352_s26 + $0x960] sm:%s4949_s11] %v1924_v2 }
 0x31e   : > { %1927 = vst [vmem:[%s4352_s26 + $0xa28] sm:%s4949_s11] %v1926_v27  ;;  %v1928_v57 = vld [vmem:[%s4063_s6 + $0x380] sm:%s4949_s11] }
 0x31f   : > { %v1930_v3 = vld [vmem:[%s4063_s6 + $0x3c0] sm:%s4949_s11]  ;;  %1929 = vst [vmem:[%s4352_s26 + $0xaf0] sm:%s4949_s11] %v1928_v57 }
 0x320   : > { %1931 = vst [vmem:[%s4352_s26 + $0xbb8] sm:%s4949_s11] %v1930_v3 }
 0x321 PF: > { %s18_s23 = sadd.s32 1, %s3095_s23   ;;  %s5057_s18 = smov %s3079_s19 }
 0x322   : > { %p15_p10 = scmp.ge.s32.totalorder %s18_s23, 6   ;;  %s5058_s19 = smov %s3083_s20 }
 0x323   : > { %s5059_s20 = smov %s3242_s29  ;;  %s5060_s21 = smov %s3091_s22 }
 0x324   : > { %s5061_s22 = smov %s5063_s25  ;;  %17 = sbr.rel (!%p15_p10) target bundleno = 4 (0x4), region = 208 }
 0x32b   :  { %2413 = vsyncpa [#allocation3], 1 }
 0x32c   :  { %2415 = vsyncpa [#allocation3 + $0x1], 1 }

</bundles_post_ra>
